<compile_context>
chip_gen: v5e
topology: v5e:2x2
jax: 0.10.0
libtpu: 0.0.40
codegen_flags: <defaults>
</compile_context>

<pallas_src>
import math

import jax
import jax.numpy as jnp
from jax.experimental import pallas as pl
from jax.experimental.pallas import tpu as pltpu

# ----------------------------- model config ---------------------------------
B = 2          # batch
S = 8          # target sequence length
S_MEM = 8      # source (memory) sequence length
D_MODEL = 32
N_HEADS = 4
D_HEAD = D_MODEL // N_HEADS
D_FF = 64
EPS = 1e-5     # layernorm eps (PyTorch default)

# Row-aligned bias / LayerNorm slab: one parameter per sublane row, lane 0 aligned.
VEC_ROWS = 16
VEC_LANES = 128
# row index -> parameter
_R_B_QKV1 = 0   # (96)  fused q|k|v bias, self-attn (q part pre-scaled)
_R_B_O1 = 1     # (32)
_R_B_Q2 = 2     # (32)  (pre-scaled)
_R_B_KV2 = 3    # (64)  fused k|v bias, cross-attn
_R_B_O2 = 4     # (32)
_R_B_FF1 = 5    # (64)
_R_B_FF2 = 6    # (32)
_R_G1, _R_BE1 = 7, 8
_R_G2, _R_BE2 = 9, 10
_R_G3, _R_BE3 = 11, 12


# --------------------------- in-kernel helpers -------------------------------
def _layer_norm(x, gamma, beta):
    mu = jnp.mean(x, axis=-1, keepdims=True)
    var = jnp.mean(jnp.square(x - mu), axis=-1, keepdims=True)
    return (x - mu) * jax.lax.rsqrt(var + EPS) * gamma + beta


def _mha(q, k, v, w_o, b_o, s_q, s_k):
    """Head-batched attention.

    q: (B*s_q, D_MODEL) with the 1/sqrt(D_HEAD) scale already folded into the Q
    projection. k, v: (B*s_k, D_MODEL). Returns (B*s_q, D_MODEL).

    Heads are folded into the einsum batch dim (size B*N_HEADS), so there are only
    two batched contractions plus a single K=D_MODEL output projection.
    """
    q3 = q.reshape(B, s_q, D_MODEL)
    k3 = k.reshape(B, s_k, D_MODEL)
    v3 = v.reshape(B, s_k, D_MODEL)

    def split_heads(t3):
        # (B, s, D_MODEL) -> (N_HEADS*B, s, D_HEAD); outer index = h*B + b.
        return jnp.concatenate(
            [t3[:, :, h * D_HEAD:(h + 1) * D_HEAD] for h in range(N_HEADS)], axis=0)

    qh = split_heads(q3)
    kh = split_heads(k3)
    vh = split_heads(v3)

    # scores / probs, batched over (head, batch)
    sc = jnp.einsum("bqd,bkd->bqk", qh, kh, preferred_element_type=jnp.float32)
    sc = sc - jnp.max(sc, axis=-1, keepdims=True)
    e = jnp.exp(sc)
    denom = jnp.sum(e, axis=-1, keepdims=True)
    # EUP approximate reciprocal + one Newton step (2 mul + 1 sub on the VPU):
    # ~f32 accuracy while the divide-heavy part runs on the otherwise-idle EUP slot.
    r = pl.reciprocal(denom, approx=True)
    r = r * (2.0 - denom * r)
    pr = e * r
    oh = jnp.einsum("bqk,bkd->bqd", pr, vh, preferred_element_type=jnp.float32)

    # merge heads back to (B*s_q, D_MODEL): single K=D_MODEL output projection.
    o = jnp.concatenate([oh[h * B:(h + 1) * B] for h in range(N_HEADS)], axis=-1)
    o = o.reshape(B * s_q, D_MODEL)
    return jnp.dot(o, w_o, preferred_element_type=jnp.float32) + b_o


# ------------------------------- kernel --------------------------------------
def decoder_layer_kernel(x_ref, mem_ref, w_qkv1_ref, w_o1_ref, w_q2_ref, w_kv2_ref,
                         w_o2_ref, w_ff1_ref, w_ff2_ref, vec_ref, out_ref):
    x = x_ref[...]          # (B*S, D_MODEL)   batch already folded in the wrapper
    mem = mem_ref[...]      # (B*S_MEM, D_MODEL)
    vec = vec_ref[...]      # (16, 128) row-aligned bias / LayerNorm slab

    b_qkv1 = vec[_R_B_QKV1:_R_B_QKV1 + 1, 0:3 * D_MODEL]
    b_o1 = vec[_R_B_O1:_R_B_O1 + 1, 0:D_MODEL]
    b_q2 = vec[_R_B_Q2:_R_B_Q2 + 1, 0:D_MODEL]
    b_kv2 = vec[_R_B_KV2:_R_B_KV2 + 1, 0:2 * D_MODEL]
    b_o2 = vec[_R_B_O2:_R_B_O2 + 1, 0:D_MODEL]
    b_ff1 = vec[_R_B_FF1:_R_B_FF1 + 1, 0:D_FF]
    b_ff2 = vec[_R_B_FF2:_R_B_FF2 + 1, 0:D_MODEL]
    g1, be1 = vec[_R_G1:_R_G1 + 1, 0:D_MODEL], vec[_R_BE1:_R_BE1 + 1, 0:D_MODEL]
    g2, be2 = vec[_R_G2:_R_G2 + 1, 0:D_MODEL], vec[_R_BE2:_R_BE2 + 1, 0:D_MODEL]
    g3, be3 = vec[_R_G3:_R_G3 + 1, 0:D_MODEL], vec[_R_BE3:_R_BE3 + 1, 0:D_MODEL]

    # ---- self-attention (fused QKV projection, scale folded into Q) + norm1 ----
    qkv = jnp.dot(x, w_qkv1_ref[...], preferred_element_type=jnp.float32) + b_qkv1
    sa = _mha(qkv[:, 0:D_MODEL],
              qkv[:, D_MODEL:2 * D_MODEL],
              qkv[:, 2 * D_MODEL:3 * D_MODEL],
              w_o1_ref[...], b_o1, S, S)
    x = _layer_norm(x + sa, g1, be1)

    # ---- cross-attention (fused KV projection on memory) + norm2 ----
    q2 = jnp.dot(x, w_q2_ref[...], preferred_element_type=jnp.float32) + b_q2
    kv = jnp.dot(mem, w_kv2_ref[...], preferred_element_type=jnp.float32) + b_kv2
    ca = _mha(q2, kv[:, 0:D_MODEL], kv[:, D_MODEL:2 * D_MODEL],
              w_o2_ref[...], b_o2, S, S_MEM)
    x = _layer_norm(x + ca, g2, be2)

    # ---- feed-forward (Linear -> ReLU -> Linear) + norm3 ----
    h = jnp.maximum(
        jnp.dot(x, w_ff1_ref[...], preferred_element_type=jnp.float32) + b_ff1, 0.0)
    ff = jnp.dot(h, w_ff2_ref[...], preferred_element_type=jnp.float32) + b_ff2
    x = _layer_norm(x + ff, g3, be3)

    out_ref[...] = x        # single contiguous (B*S, D_MODEL) store


# ------------------------------ wrapper ---------------------------------------
def _pack_params(p):
    """Fuse / re-layout parameters on the host (one-time cost).

    - QKV (self-attn) and KV (cross-attn) weights fused along the out-feature axis.
    - 1/sqrt(D_HEAD) attention score scale folded into the Q weights and biases.
    - All biases + LayerNorm params packed as a row-aligned (16, 128) slab
      (one parameter per sublane row, starting at lane 0).
    """
    scale = 1.0 / math.sqrt(D_HEAD)
    w_qkv1 = jnp.concatenate([p["wq1"] * scale, p["wk1"], p["wv1"]], axis=1)  # (32, 96)
    w_kv2 = jnp.concatenate([p["wk2"], p["wv2"]], axis=1)                     # (32, 64)
    w_q2 = p["wq2"] * scale                                                   # (32, 32)

    def row(v):  # (1, n) -> (1, VEC_LANES) zero-padded, lane-0 aligned
        return jnp.pad(v.astype(jnp.float32), ((0, 0), (0, VEC_LANES - v.shape[1])))

    rows = [
        row(jnp.concatenate([p["bq1"] * scale, p["bk1"], p["bv1"]], axis=1)),  # 0
        row(p["bo1"]),                                                         # 1
        row(p["bq2"] * scale),                                                 # 2
        row(jnp.concatenate([p["bk2"], p["bv2"]], axis=1)),                    # 3
        row(p["bo2"]),                                                         # 4
        row(p["b1"]),                                                          # 5
        row(p["b2"]),                                                          # 6
        row(p["g1"]), row(p["be1"]),                                           # 7, 8
        row(p["g2"]), row(p["be2"]),                                           # 9, 10
        row(p["g3"]), row(p["be3"]),                                           # 11, 12
        jnp.zeros((VEC_ROWS - 13, VEC_LANES), jnp.float32),                    # padding
    ]
    vec = jnp.concatenate(rows, axis=0)
    assert vec.shape == (VEC_ROWS, VEC_LANES)
    return (w_qkv1, p["wo1"], w_q2, w_kv2, p["wo2"], p["w1"], p["w2"], vec)


def transformer_decoder_layer(x, memory, params):
    """x: (B, S, D_MODEL); memory: (B, S_MEM, D_MODEL); params: dict of weights."""
    w_qkv1, w_o1, w_q2, w_kv2, w_o2, w_ff1, w_ff2, vec = _pack_params(params)
    # Fold batch outside the kernel: reshape here is free in XLA and guarantees
    # Mosaic never materializes a fold/unfold relayout in-kernel.
    x2 = x.reshape(B * S, D_MODEL)
    mem2 = memory.reshape(B * S_MEM, D_MODEL)
    vmem = pl.BlockSpec(memory_space=pltpu.MemorySpace.VMEM)   # whole array in VMEM
    out2 = pl.pallas_call(
        decoder_layer_kernel,
        out_shape=jax.ShapeDtypeStruct((B * S, D_MODEL), jnp.float32),
        in_specs=[vmem] * 10,
        out_specs=vmem,
        cost_estimate=pl.CostEstimate(flops=800_000, transcendentals=2_000,
                                      bytes_accessed=200_000),
    )(x2, mem2, w_qkv1, w_o1, w_q2, w_kv2, w_o2, w_ff1, w_ff2, vec)
    return out2.reshape(B, S, D_MODEL)


# --------------- independent pure-JAX reference (unpacked params) -------------
def _reference(x, memory, p):
    def mha(q_in, k_in, v_in, wq, bq, wk, bk, wv, bv, wo, bo):
        q = q_in @ wq + bq
        k = k_in @ wk + bk
        v = v_in @ wv + bv

        def split(t):   # (S, D) -> (H, S, dh)
            return t.reshape(t.shape[0], N_HEADS, D_HEAD).transpose(1, 0, 2)

        qh, kh, vh = split(q), split(k), split(v)
        scores = jnp.einsum("hqd,hkd->hqk", qh, kh) / math.sqrt(D_HEAD)
        probs = jax.nn.softmax(scores, axis=-1)
        o = jnp.einsum("hqk,hkd->hqd", probs, vh)
        o = o.transpose(1, 0, 2).reshape(q_in.shape[0], D_MODEL)
        return o @ wo + bo

    def layer_norm(t, g, b):
        mu = t.mean(-1, keepdims=True)
        var = ((t - mu) ** 2).mean(-1, keepdims=True)
        return (t - mu) / jnp.sqrt(var + EPS) * g + b

    def one(xb, mb):
        sa = mha(xb, xb, xb, p["wq1"], p["bq1"], p["wk1"], p["bk1"],
                 p["wv1"], p["bv1"], p["wo1"], p["bo1"])
        xb = layer_norm(xb + sa, p["g1"], p["be1"])
        ca = mha(xb, mb, mb, p["wq2"], p["bq2"], p["wk2"], p["bk2"],
                 p["wv2"], p["bv2"], p["wo2"], p["bo2"])
        xb = layer_norm(xb + ca, p["g2"], p["be2"])
        h = jax.nn.relu(xb @ p["w1"] + p["b1"])
        ff = h @ p["w2"] + p["b2"]
        return layer_norm(xb + ff, p["g3"], p["be3"])

    return jax.vmap(one)(x, memory)


# ------------------------------- main ------------------------------------------
def _init_params(key):
    ks = jax.random.split(key, 32)
    i = iter(range(32))

    def w(shape, k):
        return (0.05 * jax.random.normal(k, shape)).astype(jnp.float32)

    p = {}
    # self / cross attention projections (weights (in, out), biases (1, out))
    for tag in ("1", "2"):
        for name in ("wq", "wk", "wv", "wo"):
            p[name + tag] = w((D_MODEL, D_MODEL), ks[next(i)])
            p["b" + name[1] + tag] = w((1, D_MODEL), ks[next(i)])
    # feed-forward
    p["w1"] = w((D_MODEL, D_FF), ks[next(i)])
    p["b1"] = w((1, D_FF), ks[next(i)])
    p["w2"] = w((D_FF, D_MODEL), ks[next(i)])
    p["b2"] = w((1, D_MODEL), ks[next(i)])
    # layer norms
    for n in ("1", "2", "3"):
        p["g" + n] = jnp.ones((1, D_MODEL), jnp.float32)
        p["be" + n] = jnp.zeros((1, D_MODEL), jnp.float32)
    return p


if __name__ == "__main__":
    key = jax.random.PRNGKey(0)
    k_x, k_m, k_p = jax.random.split(key, 3)
    x = jax.random.normal(k_x, (B, S, D_MODEL), dtype=jnp.float32)
    memory = jax.random.normal(k_m, (B, S_MEM, D_MODEL), dtype=jnp.float32)
    params = _init_params(k_p)

    out = transformer_decoder_layer(x, memory, params)
    out = jax.block_until_ready(out)

    ref = jax.block_until_ready(_reference(x, memory, params))
    assert out.shape == (B, S, D_MODEL)
    assert jnp.allclose(out, ref, atol=5e-4, rtol=5e-4), "mismatch vs JAX reference"
    print("KERNEL_OK")
</pallas_src>

<mosaic_0001>
module attributes {stable_mosaic.version = 11 : i64} {
  func.func @decoder_layer_kernel(%arg0: memref<16x32xf32, #tpu.memory_space<vmem>>, %arg1: memref<16x32xf32, #tpu.memory_space<vmem>>, %arg2: memref<32x96xf32, #tpu.memory_space<vmem>>, %arg3: memref<32x32xf32, #tpu.memory_space<vmem>>, %arg4: memref<32x32xf32, #tpu.memory_space<vmem>>, %arg5: memref<32x64xf32, #tpu.memory_space<vmem>>, %arg6: memref<32x32xf32, #tpu.memory_space<vmem>>, %arg7: memref<32x64xf32, #tpu.memory_space<vmem>>, %arg8: memref<64x32xf32, #tpu.memory_space<vmem>>, %arg9: memref<16x128xf32, #tpu.memory_space<vmem>>, %arg10: memref<16x32xf32, #tpu.memory_space<vmem>>) attributes {dimension_semantics = [], scalar_prefetch = 0 : i64, scratch_operands = 0 : i64, tpu.core_type = #tpu.core_type<tc>} {
    %c0 = arith.constant 0 : index
    %c0_0 = arith.constant 0 : index
    %0 = vector.load %arg0[%c0, %c0_0] : memref<16x32xf32, #tpu.memory_space<vmem>>, vector<16x32xf32>
    %c0_1 = arith.constant 0 : index
    %c0_2 = arith.constant 0 : index
    %1 = vector.load %arg1[%c0_1, %c0_2] : memref<16x32xf32, #tpu.memory_space<vmem>>, vector<16x32xf32>
    %c0_3 = arith.constant 0 : index
    %c0_4 = arith.constant 0 : index
    %2 = vector.load %arg9[%c0_3, %c0_4] : memref<16x128xf32, #tpu.memory_space<vmem>>, vector<16x128xf32>
    %3 = vector.extract_strided_slice %2 {offsets = [0, 0], sizes = [1, 96], strides = [1, 1]} : vector<16x128xf32> to vector<1x96xf32>
    %4 = vector.extract_strided_slice %2 {offsets = [1, 0], sizes = [1, 32], strides = [1, 1]} : vector<16x128xf32> to vector<1x32xf32>
    %5 = vector.extract_strided_slice %2 {offsets = [2, 0], sizes = [1, 32], strides = [1, 1]} : vector<16x128xf32> to vector<1x32xf32>
    %6 = vector.extract_strided_slice %2 {offsets = [3, 0], sizes = [1, 64], strides = [1, 1]} : vector<16x128xf32> to vector<1x64xf32>
    %7 = vector.extract_strided_slice %2 {offsets = [4, 0], sizes = [1, 32], strides = [1, 1]} : vector<16x128xf32> to vector<1x32xf32>
    %8 = vector.extract_strided_slice %2 {offsets = [5, 0], sizes = [1, 64], strides = [1, 1]} : vector<16x128xf32> to vector<1x64xf32>
    %9 = vector.extract_strided_slice %2 {offsets = [6, 0], sizes = [1, 32], strides = [1, 1]} : vector<16x128xf32> to vector<1x32xf32>
    %10 = vector.extract_strided_slice %2 {offsets = [7, 0], sizes = [1, 32], strides = [1, 1]} : vector<16x128xf32> to vector<1x32xf32>
    %11 = vector.extract_strided_slice %2 {offsets = [8, 0], sizes = [1, 32], strides = [1, 1]} : vector<16x128xf32> to vector<1x32xf32>
    %12 = vector.extract_strided_slice %2 {offsets = [9, 0], sizes = [1, 32], strides = [1, 1]} : vector<16x128xf32> to vector<1x32xf32>
    %13 = vector.extract_strided_slice %2 {offsets = [10, 0], sizes = [1, 32], strides = [1, 1]} : vector<16x128xf32> to vector<1x32xf32>
    %14 = vector.extract_strided_slice %2 {offsets = [11, 0], sizes = [1, 32], strides = [1, 1]} : vector<16x128xf32> to vector<1x32xf32>
    %15 = vector.extract_strided_slice %2 {offsets = [12, 0], sizes = [1, 32], strides = [1, 1]} : vector<16x128xf32> to vector<1x32xf32>
    %c0_5 = arith.constant 0 : index
    %c0_6 = arith.constant 0 : index
    %16 = vector.load %arg2[%c0_5, %c0_6] : memref<32x96xf32, #tpu.memory_space<vmem>>, vector<32x96xf32>
    %cst = arith.constant dense<0.000000e+00> : vector<16x96xf32>
    %17 = tpu.matmul %0, %16, %cst {dimension_numbers = #tpu.dot_dimension_numbers<[1], [0], [0], [1], [0, 0, 1, 1], [], []>} : vector<16x32xf32>, vector<32x96xf32>, vector<16x96xf32> -> vector<16x96xf32>
    %18 = vector.broadcast %3 : vector<1x96xf32> to vector<16x96xf32>
    %19 = arith.addf %17, %18 : vector<16x96xf32>
    %20 = vector.extract_strided_slice %19 {offsets = [0, 0], sizes = [16, 32], strides = [1, 1]} : vector<16x96xf32> to vector<16x32xf32>
    %21 = vector.extract_strided_slice %19 {offsets = [0, 32], sizes = [16, 32], strides = [1, 1]} : vector<16x96xf32> to vector<16x32xf32>
    %22 = vector.extract_strided_slice %19 {offsets = [0, 64], sizes = [16, 32], strides = [1, 1]} : vector<16x96xf32> to vector<16x32xf32>
    %c0_7 = arith.constant 0 : index
    %c0_8 = arith.constant 0 : index
    %23 = vector.load %arg3[%c0_7, %c0_8] : memref<32x32xf32, #tpu.memory_space<vmem>>, vector<32x32xf32>
    %24 = vector.shape_cast %20 : vector<16x32xf32> to vector<2x8x32xf32>
    %25 = vector.shape_cast %21 : vector<16x32xf32> to vector<2x8x32xf32>
    %26 = vector.shape_cast %22 : vector<16x32xf32> to vector<2x8x32xf32>
    %27 = vector.extract_strided_slice %24 {offsets = [0, 0, 0], sizes = [2, 8, 8], strides = [1, 1, 1]} : vector<2x8x32xf32> to vector<2x8x8xf32>
    %28 = vector.extract_strided_slice %24 {offsets = [0, 0, 8], sizes = [2, 8, 8], strides = [1, 1, 1]} : vector<2x8x32xf32> to vector<2x8x8xf32>
    %29 = vector.extract_strided_slice %24 {offsets = [0, 0, 16], sizes = [2, 8, 8], strides = [1, 1, 1]} : vector<2x8x32xf32> to vector<2x8x8xf32>
    %30 = vector.extract_strided_slice %24 {offsets = [0, 0, 24], sizes = [2, 8, 8], strides = [1, 1, 1]} : vector<2x8x32xf32> to vector<2x8x8xf32>
    %31 = tpu.concatenate %27, %28, %29, %30 in 0 : vector<2x8x8xf32>, vector<2x8x8xf32>, vector<2x8x8xf32>, vector<2x8x8xf32> -> vector<8x8x8xf32>
    %32 = vector.extract_strided_slice %25 {offsets = [0, 0, 0], sizes = [2, 8, 8], strides = [1, 1, 1]} : vector<2x8x32xf32> to vector<2x8x8xf32>
    %33 = vector.extract_strided_slice %25 {offsets = [0, 0, 8], sizes = [2, 8, 8], strides = [1, 1, 1]} : vector<2x8x32xf32> to vector<2x8x8xf32>
    %34 = vector.extract_strided_slice %25 {offsets = [0, 0, 16], sizes = [2, 8, 8], strides = [1, 1, 1]} : vector<2x8x32xf32> to vector<2x8x8xf32>
    %35 = vector.extract_strided_slice %25 {offsets = [0, 0, 24], sizes = [2, 8, 8], strides = [1, 1, 1]} : vector<2x8x32xf32> to vector<2x8x8xf32>
    %36 = tpu.concatenate %32, %33, %34, %35 in 0 : vector<2x8x8xf32>, vector<2x8x8xf32>, vector<2x8x8xf32>, vector<2x8x8xf32> -> vector<8x8x8xf32>
    %37 = vector.extract_strided_slice %26 {offsets = [0, 0, 0], sizes = [2, 8, 8], strides = [1, 1, 1]} : vector<2x8x32xf32> to vector<2x8x8xf32>
    %38 = vector.extract_strided_slice %26 {offsets = [0, 0, 8], sizes = [2, 8, 8], strides = [1, 1, 1]} : vector<2x8x32xf32> to vector<2x8x8xf32>
    %39 = vector.extract_strided_slice %26 {offsets = [0, 0, 16], sizes = [2, 8, 8], strides = [1, 1, 1]} : vector<2x8x32xf32> to vector<2x8x8xf32>
    %40 = vector.extract_strided_slice %26 {offsets = [0, 0, 24], sizes = [2, 8, 8], strides = [1, 1, 1]} : vector<2x8x32xf32> to vector<2x8x8xf32>
    %41 = tpu.concatenate %37, %38, %39, %40 in 0 : vector<2x8x8xf32>, vector<2x8x8xf32>, vector<2x8x8xf32>, vector<2x8x8xf32> -> vector<8x8x8xf32>
    "tpu.trace_start"() <{level = 10 : i32, message = "bqd,bkd->bqk"}> : () -> ()
    %cst_9 = arith.constant dense<0.000000e+00> : vector<8x8x8xf32>
    %42 = tpu.matmul %31, %36, %cst_9 {dimension_numbers = #tpu.dot_dimension_numbers<[2], [2], [1], [1], [0, 0, 0, 1, 1, 1], [0], [0]>} : vector<8x8x8xf32>, vector<8x8x8xf32>, vector<8x8x8xf32> -> vector<8x8x8xf32>
    "tpu.trace_stop"() : () -> ()
    %cst_10 = arith.constant dense<0xFF800000> : vector<8x8xf32>
    %43 = vector.multi_reduction <maximumf>, %42, %cst_10 [2] : vector<8x8x8xf32> to vector<8x8xf32>
    %44 = vector.shape_cast %43 : vector<8x8xf32> to vector<8x8x1xf32>
    %45 = vector.broadcast %44 : vector<8x8x1xf32> to vector<8x8x8xf32>
    %46 = arith.subf %42, %45 : vector<8x8x8xf32>
    %47 = math.exp %46 : vector<8x8x8xf32>
    %cst_11 = arith.constant dense<0.000000e+00> : vector<8x8xf32>
    %48 = vector.multi_reduction <add>, %47, %cst_11 [2] : vector<8x8x8xf32> to vector<8x8xf32>
    %49 = vector.shape_cast %48 : vector<8x8xf32> to vector<8x8x1xf32>
    %50 = tpu.reciprocal %49 {approx = true} : vector<8x8x1xf32> -> vector<8x8x1xf32>
    %51 = arith.mulf %49, %50 : vector<8x8x1xf32>
    %cst_12 = arith.constant 2.000000e+00 : f32
    %52 = vector.broadcast %cst_12 : f32 to vector<8x8x1xf32>
    %53 = arith.subf %52, %51 : vector<8x8x1xf32>
    %54 = arith.mulf %50, %53 : vector<8x8x1xf32>
    %55 = vector.broadcast %54 : vector<8x8x1xf32> to vector<8x8x8xf32>
    %56 = arith.mulf %47, %55 : vector<8x8x8xf32>
    "tpu.trace_start"() <{level = 10 : i32, message = "bqk,bkd->bqd"}> : () -> ()
    %cst_13 = arith.constant dense<0.000000e+00> : vector<8x8x8xf32>
    %57 = tpu.matmul %56, %41, %cst_13 {dimension_numbers = #tpu.dot_dimension_numbers<[2], [1], [1], [2], [0, 0, 0, 1, 1, 2], [0], [0]>} : vector<8x8x8xf32>, vector<8x8x8xf32>, vector<8x8x8xf32> -> vector<8x8x8xf32>
    "tpu.trace_stop"() : () -> ()
    %58 = vector.extract_strided_slice %57 {offsets = [0, 0, 0], sizes = [2, 8, 8], strides = [1, 1, 1]} : vector<8x8x8xf32> to vector<2x8x8xf32>
    %59 = vector.extract_strided_slice %57 {offsets = [2, 0, 0], sizes = [2, 8, 8], strides = [1, 1, 1]} : vector<8x8x8xf32> to vector<2x8x8xf32>
    %60 = vector.extract_strided_slice %57 {offsets = [4, 0, 0], sizes = [2, 8, 8], strides = [1, 1, 1]} : vector<8x8x8xf32> to vector<2x8x8xf32>
    %61 = vector.extract_strided_slice %57 {offsets = [6, 0, 0], sizes = [2, 8, 8], strides = [1, 1, 1]} : vector<8x8x8xf32> to vector<2x8x8xf32>
    %62 = tpu.concatenate %58, %59, %60, %61 in 2 : vector<2x8x8xf32>, vector<2x8x8xf32>, vector<2x8x8xf32>, vector<2x8x8xf32> -> vector<2x8x32xf32>
    %63 = vector.shape_cast %62 : vector<2x8x32xf32> to vector<16x32xf32>
    %cst_14 = arith.constant dense<0.000000e+00> : vector<16x32xf32>
    %64 = tpu.matmul %63, %23, %cst_14 {dimension_numbers = #tpu.dot_dimension_numbers<[1], [0], [0], [1], [0, 0, 1, 1], [], []>} : vector<16x32xf32>, vector<32x32xf32>, vector<16x32xf32> -> vector<16x32xf32>
    %65 = vector.broadcast %4 : vector<1x32xf32> to vector<16x32xf32>
    %66 = arith.addf %64, %65 : vector<16x32xf32>
    %67 = arith.addf %0, %66 : vector<16x32xf32>
    %cst_15 = arith.constant dense<0.000000e+00> : vector<16xf32>
    %68 = vector.multi_reduction <add>, %67, %cst_15 [1] : vector<16x32xf32> to vector<16xf32>
    %69 = vector.shape_cast %68 : vector<16xf32> to vector<16x1xf32>
    %cst_16 = arith.constant 3.200000e+01 : f32
    %70 = vector.broadcast %cst_16 : f32 to vector<16x1xf32>
    %71 = arith.divf %69, %70 : vector<16x1xf32>
    %72 = vector.broadcast %71 : vector<16x1xf32> to vector<16x32xf32>
    %73 = arith.subf %67, %72 : vector<16x32xf32>
    %74 = arith.mulf %73, %73 : vector<16x32xf32>
    %cst_17 = arith.constant dense<0.000000e+00> : vector<16xf32>
    %75 = vector.multi_reduction <add>, %74, %cst_17 [1] : vector<16x32xf32> to vector<16xf32>
    %76 = vector.shape_cast %75 : vector<16xf32> to vector<16x1xf32>
    %cst_18 = arith.constant 3.200000e+01 : f32
    %77 = vector.broadcast %cst_18 : f32 to vector<16x1xf32>
    %78 = arith.divf %76, %77 : vector<16x1xf32>
    %79 = vector.broadcast %71 : vector<16x1xf32> to vector<16x32xf32>
    %80 = arith.subf %67, %79 : vector<16x32xf32>
    %cst_19 = arith.constant 9.99999974E-6 : f32
    %81 = vector.broadcast %cst_19 : f32 to vector<16x1xf32>
    %82 = arith.addf %78, %81 : vector<16x1xf32>
    %83 = math.rsqrt %82 : vector<16x1xf32>
    %84 = vector.broadcast %83 : vector<16x1xf32> to vector<16x32xf32>
    %85 = arith.mulf %80, %84 : vector<16x32xf32>
    %86 = vector.broadcast %10 : vector<1x32xf32> to vector<16x32xf32>
    %87 = arith.mulf %85, %86 : vector<16x32xf32>
    %88 = vector.broadcast %11 : vector<1x32xf32> to vector<16x32xf32>
    %89 = arith.addf %87, %88 : vector<16x32xf32>
    %c0_20 = arith.constant 0 : index
    %c0_21 = arith.constant 0 : index
    %90 = vector.load %arg4[%c0_20, %c0_21] : memref<32x32xf32, #tpu.memory_space<vmem>>, vector<32x32xf32>
    %cst_22 = arith.constant dense<0.000000e+00> : vector<16x32xf32>
    %91 = tpu.matmul %89, %90, %cst_22 {dimension_numbers = #tpu.dot_dimension_numbers<[1], [0], [0], [1], [0, 0, 1, 1], [], []>} : vector<16x32xf32>, vector<32x32xf32>, vector<16x32xf32> -> vector<16x32xf32>
    %92 = vector.broadcast %5 : vector<1x32xf32> to vector<16x32xf32>
    %93 = arith.addf %91, %92 : vector<16x32xf32>
    %c0_23 = arith.constant 0 : index
    %c0_24 = arith.constant 0 : index
    %94 = vector.load %arg5[%c0_23, %c0_24] : memref<32x64xf32, #tpu.memory_space<vmem>>, vector<32x64xf32>
    %cst_25 = arith.constant dense<0.000000e+00> : vector<16x64xf32>
    %95 = tpu.matmul %1, %94, %cst_25 {dimension_numbers = #tpu.dot_dimension_numbers<[1], [0], [0], [1], [0, 0, 1, 1], [], []>} : vector<16x32xf32>, vector<32x64xf32>, vector<16x64xf32> -> vector<16x64xf32>
    %96 = vector.broadcast %6 : vector<1x64xf32> to vector<16x64xf32>
    %97 = arith.addf %95, %96 : vector<16x64xf32>
    %98 = vector.extract_strided_slice %97 {offsets = [0, 0], sizes = [16, 32], strides = [1, 1]} : vector<16x64xf32> to vector<16x32xf32>
    %99 = vector.extract_strided_slice %97 {offsets = [0, 32], sizes = [16, 32], strides = [1, 1]} : vector<16x64xf32> to vector<16x32xf32>
    %c0_26 = arith.constant 0 : index
    %c0_27 = arith.constant 0 : index
    %100 = vector.load %arg6[%c0_26, %c0_27] : memref<32x32xf32, #tpu.memory_space<vmem>>, vector<32x32xf32>
    %101 = vector.shape_cast %93 : vector<16x32xf32> to vector<2x8x32xf32>
    %102 = vector.shape_cast %98 : vector<16x32xf32> to vector<2x8x32xf32>
    %103 = vector.shape_cast %99 : vector<16x32xf32> to vector<2x8x32xf32>
    %104 = vector.extract_strided_slice %101 {offsets = [0, 0, 0], sizes = [2, 8, 8], strides = [1, 1, 1]} : vector<2x8x32xf32> to vector<2x8x8xf32>
    %105 = vector.extract_strided_slice %101 {offsets = [0, 0, 8], sizes = [2, 8, 8], strides = [1, 1, 1]} : vector<2x8x32xf32> to vector<2x8x8xf32>
    %106 = vector.extract_strided_slice %101 {offsets = [0, 0, 16], sizes = [2, 8, 8], strides = [1, 1, 1]} : vector<2x8x32xf32> to vector<2x8x8xf32>
    %107 = vector.extract_strided_slice %101 {offsets = [0, 0, 24], sizes = [2, 8, 8], strides = [1, 1, 1]} : vector<2x8x32xf32> to vector<2x8x8xf32>
    %108 = tpu.concatenate %104, %105, %106, %107 in 0 : vector<2x8x8xf32>, vector<2x8x8xf32>, vector<2x8x8xf32>, vector<2x8x8xf32> -> vector<8x8x8xf32>
    %109 = vector.extract_strided_slice %102 {offsets = [0, 0, 0], sizes = [2, 8, 8], strides = [1, 1, 1]} : vector<2x8x32xf32> to vector<2x8x8xf32>
    %110 = vector.extract_strided_slice %102 {offsets = [0, 0, 8], sizes = [2, 8, 8], strides = [1, 1, 1]} : vector<2x8x32xf32> to vector<2x8x8xf32>
    %111 = vector.extract_strided_slice %102 {offsets = [0, 0, 16], sizes = [2, 8, 8], strides = [1, 1, 1]} : vector<2x8x32xf32> to vector<2x8x8xf32>
    %112 = vector.extract_strided_slice %102 {offsets = [0, 0, 24], sizes = [2, 8, 8], strides = [1, 1, 1]} : vector<2x8x32xf32> to vector<2x8x8xf32>
    %113 = tpu.concatenate %109, %110, %111, %112 in 0 : vector<2x8x8xf32>, vector<2x8x8xf32>, vector<2x8x8xf32>, vector<2x8x8xf32> -> vector<8x8x8xf32>
    %114 = vector.extract_strided_slice %103 {offsets = [0, 0, 0], sizes = [2, 8, 8], strides = [1, 1, 1]} : vector<2x8x32xf32> to vector<2x8x8xf32>
    %115 = vector.extract_strided_slice %103 {offsets = [0, 0, 8], sizes = [2, 8, 8], strides = [1, 1, 1]} : vector<2x8x32xf32> to vector<2x8x8xf32>
    %116 = vector.extract_strided_slice %103 {offsets = [0, 0, 16], sizes = [2, 8, 8], strides = [1, 1, 1]} : vector<2x8x32xf32> to vector<2x8x8xf32>
    %117 = vector.extract_strided_slice %103 {offsets = [0, 0, 24], sizes = [2, 8, 8], strides = [1, 1, 1]} : vector<2x8x32xf32> to vector<2x8x8xf32>
    %118 = tpu.concatenate %114, %115, %116, %117 in 0 : vector<2x8x8xf32>, vector<2x8x8xf32>, vector<2x8x8xf32>, vector<2x8x8xf32> -> vector<8x8x8xf32>
    "tpu.trace_start"() <{level = 10 : i32, message = "bqd,bkd->bqk"}> : () -> ()
    %cst_28 = arith.constant dense<0.000000e+00> : vector<8x8x8xf32>
    %119 = tpu.matmul %108, %113, %cst_28 {dimension_numbers = #tpu.dot_dimension_numbers<[2], [2], [1], [1], [0, 0, 0, 1, 1, 1], [0], [0]>} : vector<8x8x8xf32>, vector<8x8x8xf32>, vector<8x8x8xf32> -> vector<8x8x8xf32>
    "tpu.trace_stop"() : () -> ()
    %cst_29 = arith.constant dense<0xFF800000> : vector<8x8xf32>
    %120 = vector.multi_reduction <maximumf>, %119, %cst_29 [2] : vector<8x8x8xf32> to vector<8x8xf32>
    %121 = vector.shape_cast %120 : vector<8x8xf32> to vector<8x8x1xf32>
    %122 = vector.broadcast %121 : vector<8x8x1xf32> to vector<8x8x8xf32>
    %123 = arith.subf %119, %122 : vector<8x8x8xf32>
    %124 = math.exp %123 : vector<8x8x8xf32>
    %cst_30 = arith.constant dense<0.000000e+00> : vector<8x8xf32>
    %125 = vector.multi_reduction <add>, %124, %cst_30 [2] : vector<8x8x8xf32> to vector<8x8xf32>
    %126 = vector.shape_cast %125 : vector<8x8xf32> to vector<8x8x1xf32>
    %127 = tpu.reciprocal %126 {approx = true} : vector<8x8x1xf32> -> vector<8x8x1xf32>
    %128 = arith.mulf %126, %127 : vector<8x8x1xf32>
    %cst_31 = arith.constant 2.000000e+00 : f32
    %129 = vector.broadcast %cst_31 : f32 to vector<8x8x1xf32>
    %130 = arith.subf %129, %128 : vector<8x8x1xf32>
    %131 = arith.mulf %127, %130 : vector<8x8x1xf32>
    %132 = vector.broadcast %131 : vector<8x8x1xf32> to vector<8x8x8xf32>
    %133 = arith.mulf %124, %132 : vector<8x8x8xf32>
    "tpu.trace_start"() <{level = 10 : i32, message = "bqk,bkd->bqd"}> : () -> ()
    %cst_32 = arith.constant dense<0.000000e+00> : vector<8x8x8xf32>
    %134 = tpu.matmul %133, %118, %cst_32 {dimension_numbers = #tpu.dot_dimension_numbers<[2], [1], [1], [2], [0, 0, 0, 1, 1, 2], [0], [0]>} : vector<8x8x8xf32>, vector<8x8x8xf32>, vector<8x8x8xf32> -> vector<8x8x8xf32>
    "tpu.trace_stop"() : () -> ()
    %135 = vector.extract_strided_slice %134 {offsets = [0, 0, 0], sizes = [2, 8, 8], strides = [1, 1, 1]} : vector<8x8x8xf32> to vector<2x8x8xf32>
    %136 = vector.extract_strided_slice %134 {offsets = [2, 0, 0], sizes = [2, 8, 8], strides = [1, 1, 1]} : vector<8x8x8xf32> to vector<2x8x8xf32>
    %137 = vector.extract_strided_slice %134 {offsets = [4, 0, 0], sizes = [2, 8, 8], strides = [1, 1, 1]} : vector<8x8x8xf32> to vector<2x8x8xf32>
    %138 = vector.extract_strided_slice %134 {offsets = [6, 0, 0], sizes = [2, 8, 8], strides = [1, 1, 1]} : vector<8x8x8xf32> to vector<2x8x8xf32>
    %139 = tpu.concatenate %135, %136, %137, %138 in 2 : vector<2x8x8xf32>, vector<2x8x8xf32>, vector<2x8x8xf32>, vector<2x8x8xf32> -> vector<2x8x32xf32>
    %140 = vector.shape_cast %139 : vector<2x8x32xf32> to vector<16x32xf32>
    %cst_33 = arith.constant dense<0.000000e+00> : vector<16x32xf32>
    %141 = tpu.matmul %140, %100, %cst_33 {dimension_numbers = #tpu.dot_dimension_numbers<[1], [0], [0], [1], [0, 0, 1, 1], [], []>} : vector<16x32xf32>, vector<32x32xf32>, vector<16x32xf32> -> vector<16x32xf32>
    %142 = vector.broadcast %7 : vector<1x32xf32> to vector<16x32xf32>
    %143 = arith.addf %141, %142 : vector<16x32xf32>
    %144 = arith.addf %89, %143 : vector<16x32xf32>
    %cst_34 = arith.constant dense<0.000000e+00> : vector<16xf32>
    %145 = vector.multi_reduction <add>, %144, %cst_34 [1] : vector<16x32xf32> to vector<16xf32>
    %146 = vector.shape_cast %145 : vector<16xf32> to vector<16x1xf32>
    %cst_35 = arith.constant 3.200000e+01 : f32
    %147 = vector.broadcast %cst_35 : f32 to vector<16x1xf32>
    %148 = arith.divf %146, %147 : vector<16x1xf32>
    %149 = vector.broadcast %148 : vector<16x1xf32> to vector<16x32xf32>
    %150 = arith.subf %144, %149 : vector<16x32xf32>
    %151 = arith.mulf %150, %150 : vector<16x32xf32>
    %cst_36 = arith.constant dense<0.000000e+00> : vector<16xf32>
    %152 = vector.multi_reduction <add>, %151, %cst_36 [1] : vector<16x32xf32> to vector<16xf32>
    %153 = vector.shape_cast %152 : vector<16xf32> to vector<16x1xf32>
    %cst_37 = arith.constant 3.200000e+01 : f32
    %154 = vector.broadcast %cst_37 : f32 to vector<16x1xf32>
    %155 = arith.divf %153, %154 : vector<16x1xf32>
    %156 = vector.broadcast %148 : vector<16x1xf32> to vector<16x32xf32>
    %157 = arith.subf %144, %156 : vector<16x32xf32>
    %cst_38 = arith.constant 9.99999974E-6 : f32
    %158 = vector.broadcast %cst_38 : f32 to vector<16x1xf32>
    %159 = arith.addf %155, %158 : vector<16x1xf32>
    %160 = math.rsqrt %159 : vector<16x1xf32>
    %161 = vector.broadcast %160 : vector<16x1xf32> to vector<16x32xf32>
    %162 = arith.mulf %157, %161 : vector<16x32xf32>
    %163 = vector.broadcast %12 : vector<1x32xf32> to vector<16x32xf32>
    %164 = arith.mulf %162, %163 : vector<16x32xf32>
    %165 = vector.broadcast %13 : vector<1x32xf32> to vector<16x32xf32>
    %166 = arith.addf %164, %165 : vector<16x32xf32>
    %c0_39 = arith.constant 0 : index
    %c0_40 = arith.constant 0 : index
    %167 = vector.load %arg7[%c0_39, %c0_40] : memref<32x64xf32, #tpu.memory_space<vmem>>, vector<32x64xf32>
    %cst_41 = arith.constant dense<0.000000e+00> : vector<16x64xf32>
    %168 = tpu.matmul %166, %167, %cst_41 {dimension_numbers = #tpu.dot_dimension_numbers<[1], [0], [0], [1], [0, 0, 1, 1], [], []>} : vector<16x32xf32>, vector<32x64xf32>, vector<16x64xf32> -> vector<16x64xf32>
    %169 = vector.broadcast %8 : vector<1x64xf32> to vector<16x64xf32>
    %170 = arith.addf %168, %169 : vector<16x64xf32>
    %cst_42 = arith.constant 0.000000e+00 : f32
    %171 = vector.broadcast %cst_42 : f32 to vector<16x64xf32>
    %172 = arith.maximumf %170, %171 : vector<16x64xf32>
    %c0_43 = arith.constant 0 : index
    %c0_44 = arith.constant 0 : index
    %173 = vector.load %arg8[%c0_43, %c0_44] : memref<64x32xf32, #tpu.memory_space<vmem>>, vector<64x32xf32>
    %cst_45 = arith.constant dense<0.000000e+00> : vector<16x32xf32>
    %174 = tpu.matmul %172, %173, %cst_45 {dimension_numbers = #tpu.dot_dimension_numbers<[1], [0], [0], [1], [0, 0, 1, 1], [], []>} : vector<16x64xf32>, vector<64x32xf32>, vector<16x32xf32> -> vector<16x32xf32>
    %175 = vector.broadcast %9 : vector<1x32xf32> to vector<16x32xf32>
    %176 = arith.addf %174, %175 : vector<16x32xf32>
    %177 = arith.addf %166, %176 : vector<16x32xf32>
    %cst_46 = arith.constant dense<0.000000e+00> : vector<16xf32>
    %178 = vector.multi_reduction <add>, %177, %cst_46 [1] : vector<16x32xf32> to vector<16xf32>
    %179 = vector.shape_cast %178 : vector<16xf32> to vector<16x1xf32>
    %cst_47 = arith.constant 3.200000e+01 : f32
    %180 = vector.broadcast %cst_47 : f32 to vector<16x1xf32>
    %181 = arith.divf %179, %180 : vector<16x1xf32>
    %182 = vector.broadcast %181 : vector<16x1xf32> to vector<16x32xf32>
    %183 = arith.subf %177, %182 : vector<16x32xf32>
    %184 = arith.mulf %183, %183 : vector<16x32xf32>
    %cst_48 = arith.constant dense<0.000000e+00> : vector<16xf32>
    %185 = vector.multi_reduction <add>, %184, %cst_48 [1] : vector<16x32xf32> to vector<16xf32>
    %186 = vector.shape_cast %185 : vector<16xf32> to vector<16x1xf32>
    %cst_49 = arith.constant 3.200000e+01 : f32
    %187 = vector.broadcast %cst_49 : f32 to vector<16x1xf32>
    %188 = arith.divf %186, %187 : vector<16x1xf32>
    %189 = vector.broadcast %181 : vector<16x1xf32> to vector<16x32xf32>
    %190 = arith.subf %177, %189 : vector<16x32xf32>
    %cst_50 = arith.constant 9.99999974E-6 : f32
    %191 = vector.broadcast %cst_50 : f32 to vector<16x1xf32>
    %192 = arith.addf %188, %191 : vector<16x1xf32>
    %193 = math.rsqrt %192 : vector<16x1xf32>
    %194 = vector.broadcast %193 : vector<16x1xf32> to vector<16x32xf32>
    %195 = arith.mulf %190, %194 : vector<16x32xf32>
    %196 = vector.broadcast %14 : vector<1x32xf32> to vector<16x32xf32>
    %197 = arith.mulf %195, %196 : vector<16x32xf32>
    %198 = vector.broadcast %15 : vector<1x32xf32> to vector<16x32xf32>
    %199 = arith.addf %197, %198 : vector<16x32xf32>
    %c0_51 = arith.constant 0 : index
    %c0_52 = arith.constant 0 : index
    %200 = vector.load %arg10[%c0_51, %c0_52] : memref<16x32xf32, #tpu.memory_space<vmem>>, vector<16x32xf32>
    tpu.vector_store %arg10[%c0_51, %c0_52], %199 {strides = array<i32>} : memref<16x32xf32, #tpu.memory_space<vmem>>, vector<16x32xf32>,
    return
  }
}

</mosaic_0001>

<bundles_post_ra>
// kernel: tpu_custom_call.1
= control target key start
LH: loop header
LB: loop body
LE: loop exit
PB: predicated region body
PF: predicated region fallthrough
CT: control target
= control target key end

     0   :  { %15 = vsyncpa [#allocation3], 0  ;;  %s2587_s0 = inlined_call_operand.hbm [shape: f32[16,32], index: 0, kind: input, shape index: {}]   ;;  %s2588_s1 = inlined_call_operand.hbm [shape: f32[16,32], index: 1, kind: input, shape index: {}]   ;;  %s2589_s2 = inlined_call_operand.vmem [shape: f32[32,96], index: 2, kind: input, shape index: {}]   ;;  %s2590_s3 = inlined_call_operand.vmem [shape: f32[32,32], index: 3, kind: input, shape index: {}]   ;;  %s2591_s4 = inlined_call_operand.vmem [shape: f32[32,32], index: 4, kind: input, shape index: {}]   ;;  %s2592_s5 = inlined_call_operand.hbm [shape: f32[32,64], index: 5, kind: input, shape index: {}]   ;;  %s2593_s6 = inlined_call_operand.hbm [shape: f32[32,32], index: 6, kind: input, shape index: {}]   ;;  %s2594_s7 = inlined_call_operand.hbm [shape: f32[32,64], index: 7, kind: input, shape index: {}]   ;;  %s2595_s8 = inlined_call_operand.vmem [shape: f32[64,32], index: 8, kind: input, shape index: {}]   ;;  %s2596_s9 = inlined_call_operand.hbm [shape: f32[16,128], index: 9, kind: input, shape index: {}]   ;;  %s2597_s10 = inlined_call_operand.hbm [shape: f32[16,32], index: 10, kind: output, shape index: {}]  }
   0x1   :  { %16 = vsyncpa [#allocation6], 0 }
   0x2   :  { %17 = vsyncpa [#allocation9], 0 }
   0x3   :  { %18 = vsyncpa [#allocation12], 0 }
   0x4   :  { %19 = vsyncpa [#allocation4], 0  ;;  %s37_s15 = sshll.u32 %s2588_s1, 4  ;;  %s2075_s16 = smov [#allocation5]   ;;  %s38_s15 = int_to_ptr.hbm [resolvable:$true] %s37_s15 }
   0x5   :  { %s39_s17 = sshll.u32 %s2075_s16, 4  ;;  %s69_s20 = sshll.u32 %s2593_s6, 4  ;;  %s40_s17 = int_to_ptr.vmem [resolvable:$true] %s39_s17  ;;  %s70_s20 = int_to_ptr.hbm [resolvable:$true] %s69_s20 }
   0x6   :  { %s2076_s21 = smov 128   ;;  %s2077_s22 = smov 8  }
   0x7   :  { %45 = dma.hbm_to_vmem [thread:$0]  %s38_s15, 256, %s40_s17, [#allocation6], %s2076_s21, %s2076_s21, %s2077_s22  }
   0x8   :  { %s2078_s23 = smov [#allocation8]   ;;  %s24_s1 = sshll.u32 %s2587_s0, 4  ;;  %s25_s1 = int_to_ptr.hbm [resolvable:$true] %s24_s1 }
   0x9   :  { %s71_s24 = sshll.u32 %s2078_s23, 4  ;;  %s56_s28 = sshll.u32 %s2592_s5, 4  ;;  %s72_s24 = int_to_ptr.vmem [resolvable:$true] %s71_s24  ;;  %s57_s28 = int_to_ptr.hbm [resolvable:$true] %s56_s28 }
   0xa   :  { %77 = dma.hbm_to_vmem [thread:$0]  %s70_s20, 512, %s72_s24, [#allocation9], %s2076_s21, %s2076_s21, %s2077_s22  }
   0xb   :  { %s2079_s29 = smov [#allocation2]   ;;  %s2080_s11 = smov [#allocation7]  }
   0xc   :  { %s26_s30 = sshll.u32 %s2079_s29, 4  ;;  %s58_s0 = sshll.u32 %s2080_s11, 4  ;;  %s27_s30 = int_to_ptr.vmem [resolvable:$true] %s26_s30  ;;  %s59_s0 = int_to_ptr.vmem [resolvable:$true] %s58_s0 }
   0xd   :  { %32 = dma.hbm_to_vmem [thread:$0]  %s25_s1, 256, %s27_s30, [#allocation3], %s2076_s21, %s2076_s21, %s2077_s22  }
   0xe   :  { %s82_s14 = sshll.u32 %s2594_s7, 4  ;;  %s97_s16 = sshll.u32 %s2596_s9, 4  ;;  %s83_s14 = int_to_ptr.hbm [resolvable:$true] %s82_s14  ;;  %s98_s16 = int_to_ptr.hbm [resolvable:$true] %s97_s16 }
   0xf   :  { %64 = dma.hbm_to_vmem [thread:$0]  %s57_s28, 512, %s59_s0, [#allocation6], %s2076_s21, %s2076_s21, %s2077_s22  }
  0x10   :  { %s2081_s17 = smov [#allocation10]   ;;  %s2082_s19 = smov [#allocation11]  }
  0x11   :  { %s84_s18 = sshll.u32 %s2081_s17, 4  ;;  %s99_s7 = sshll.u32 %s2082_s19, 4  ;;  %s85_s18 = int_to_ptr.vmem [resolvable:$true] %s84_s18  ;;  %s100_s7 = int_to_ptr.vmem [resolvable:$true] %s99_s7 }
  0x12   :  { %90 = dma.hbm_to_vmem [thread:$0]  %s83_s14, 512, %s85_s18, [#allocation9], %s2076_s21, %s2076_s21, %s2077_s22  }
  0x13   :  { %105 = dma.hbm_to_vmem [thread:$0]  %s98_s16, 256, %s100_s7, [#allocation12], %s2076_s21, %s2076_s21, %s2077_s22  }
  0x14   :  { %2065 = dma.done.wait [#allocation3], 256  }
  0x15   :  { %2066 = vsyncadd [#allocation3], 4294967040 }
  0x16   :  { %2067 = dma.done.wait [#allocation6], 768  }
  0x17   :  { %2068 = vsyncadd [#allocation6], 4294966528 }
  0x18   :  { %2069 = dma.done.wait [#allocation9], 1024  }
  0x19   :  { %2070 = vsyncadd [#allocation9], 4294966272 }
  0x1a   :  { %2071 = dma.done.wait [#allocation12], 256  }
  0x1b   :  { %2072 = vsyncadd [#allocation12], 4294967040  ;;  %v139_v0 = vld [vmem:[%s2589_s2 + $0x18] sm:$0xff]  ;;  %v138_v1 = vld [vmem:[%s2589_s2 + $0x10] sm:$0xff]  ;;  %vm141_vm0 = vcmask 261120   ;;  %s2084_s27 = smov 104  }
  0x1c   :  { %160 = vmatpush.msra.mxu0 %v139_v0  ;;  %v137_v2 = vld [vmem:[%s2589_s2 + $0x8] sm:$0xff]  ;;  %v136_v3 = vld [vmem:[%s2589_s2] sm:$0xff]  ;;  %s2083_s2 = smov 112   ;;  %s2085_s28 = smov 120   ;;  %vm191_vm1 = vcmask 64512   ;;  %vm744_vm2 = vcmask 130048  }
  0x1d   :  { %v2195_v4 = vld [vmem:[#allocation2] sm:$0xff]  ;;  %v2199_v5 = vld [vmem:[#allocation2 + $0x8] sm:$0xff]  ;;  %s2086_s29 = smov 96   ;;  %s2087_s30 = smov 64   ;;  %vm747_vm3 = vcmask 195584  }
  0x1e   :  { %161 = vmatpush.msra.mxu0 %v138_v1  ;;  %v2203_v6 = vld [vmem:[#allocation11] sm:$0xff]  ;;  %s2088_s11 = smov 16   ;;  %s2089_s0 = smov 24  }
  0x1f   :  { %v140_v7 = vperm.slane %v2203_v6, 0 }
  0x20   :  { %162 = vmatpush.msra.mxu0 %v137_v2 }
  0x22   :  { %163 = vmatpush.msra.mxu0 %v136_v3 }
  0x23   :  { %1714 = vmatmul.msk.f32.vlgmr.msra.gmra.mxu0 %vm141_vm0, %v2195_v4 }
  0x2b   :  { %1715 = vmatmul.msk.f32.gmra.mxu0 %vm141_vm0, %v2199_v5 }
  0xa0   :  { %v165_v8 = vpop.f32.mrf.mxu0 }
  0xa1   :  { %v166_v9 = vadd.f32 %v165_v8, %v140_v7 }
  0xa3   :  { %181 = vrot.lane.b32.xlu0 %v166_v9, %s2083_s2 }
  0xa8   :  { %v168_v10 = vpop.f32.mrf.mxu0 }
  0xa9   :  { %v2207_v11 = vadd.f32 %v168_v10, %v140_v7 }
  0xab   :  { %187 = vrot.lane.b32.xlu2 %v2207_v11, %s2084_s27  ;;  %179 = vrot.lane.b32.xlu1 %v2207_v11, %s2085_s28 }
  0xac   :  { %177 = vrot.lane.b32.xlu0 %v166_v9, %s2085_s28 }
  0xb3   :  { %183 = vrot.lane.b32.xlu2 %v2207_v11, %s2083_s2  ;;  %185 = vrot.lane.b32.xlu1 %v166_v9, %s2084_s27 }
  0xb4   :  { %216 = vrot.lane.b32.xlu0 %v2207_v11, %s2086_s29 }
  0xbb   :  { %189 = vrot.lane.b32.xlu1 %v166_v9, %s2086_s29 }
 0x105   :  { %v2224_v13 = vpop.permute.xlu2 %187 }
 0x10d   :  { %v2231_v16 = vpop.permute.xlu2 %183 }
 0x115   :  { %v2220_v12 = vpop.permute.xlu0 %181 }
 0x116   :  { %294 = vrot.lane.b32.xlu2 %v2220_v12, %s2086_s29 }
 0x11d   :  { %v2226_v14 = vpop.permute.xlu1 %179 }
 0x11e   :  { %v178_v15 = vpop.permute.xlu0 %177  ;;  %268 = vrot.lane.b32.xlu1 %v2226_v14, %s2086_s29 }
 0x11f   :  { %242 = vrot.lane.b32.xlu0 %v178_v15, %s2086_s29  ;;  %v1793_v19 = vpack.i.bf16 %v178_v15, %v166_v9 }
 0x125   :  { %v2233_v17 = vpop.permute.xlu1 %185 }
 0x126   :  { %v217_v18 = vpop.permute.xlu0 %216  ;;  %320 = vrot.lane.b32.xlu1 %v2231_v16, %s2086_s29  ;;  %346 = vrot.lane.b32.xlu2 %v2233_v17, %s2086_s29  ;;  %v1798_v56 = vpack.i.bf16 %v2233_v17, %v2220_v12 }
 0x127   :  { %372 = vrot.lane.b32.xlu0 %v2224_v13, %s2086_s29  ;;  %1718 = vmatpush.xpose.msk.msra.mxu2 %vm191_vm1, %v217_v18 }
 0x12a   :  { %1719 = vmatmul.msk.f32.vlgmr.msra.gmra.mxu2 %vm191_vm1, %v2207_v11 }
 0x12d   :  { %v190_v20 = vpop.permute.xlu1 %189 }
 0x12e   :  { %1716 = vmatpush.xpose.msk.msra.mxu1 %vm191_vm1, %v190_v20  ;;  %1794 = vrot.lane.b32.xlu1 %v1793_v19, %s2087_s30 }
 0x131   :  { %1717 = vmatmul.msk.f32.vlgmr.msra.gmra.mxu1 %vm191_vm1, %v166_v9 }
 0x170   :  { %v295_v21 = vpop.permute.xlu2 %294 }
 0x171   :  { %1724 = vmatpush.xpose.msk.msrb.mxu2 %vm191_vm1, %v295_v21 }
 0x174   :  { %1725 = vmatmul.msk.f32.vlgmr.msrb.gmra.mxu2 %vm191_vm1, %v2220_v12 }
 0x180   :  { %v347_v23 = vpop.permute.xlu2 %346 }
 0x190   :  { %v269_v22 = vpop.permute.xlu1 %268 }
 0x191   :  { %v243_v24 = vpop.permute.xlu0 %242  ;;  %1722 = vmatpush.xpose.msk.msrb.mxu1 %vm191_vm1, %v269_v22 }
 0x192   :  { %1720 = vmatpush.xpose.msk.msrb.mxu0 %vm191_vm1, %v243_v24 }
 0x194   :  { %1723 = vmatmul.msk.f32.vlgmr.msrb.gmra.mxu1 %vm191_vm1, %v2226_v14 }
 0x195   :  { %1728 = vmatpush.xpose.msk.msra.mxu1 %vm191_vm1, %v347_v23  ;;  %1721 = vmatmul.msk.f32.vlgmr.msrb.gmra.mxu0 %vm191_vm1, %v178_v15 }
 0x198   :  { %v321_v25 = vpop.permute.xlu1 %320 }
 0x199   :  { %v373_v26 = vpop.permute.xlu0 %372  ;;  %1726 = vmatpush.xpose.msk.msra.mxu3 %vm191_vm1, %v321_v25 }
 0x19a   :  { %1730 = vmatpush.xpose.msk.msra.mxu2 %vm191_vm1, %v373_v26 }
 0x19c   :  { %1727 = vmatmul.msk.f32.vlgmr.msra.gmra.mxu3 %vm191_vm1, %v2231_v16  ;;  %1729 = vmatmul.msk.f32.vlgmr.msra.gmra.mxu1 %vm191_vm1, %v2233_v17 }
 0x19d   :  { %1731 = vmatmul.msk.f32.vlgmr.msra.gmra.mxu2 %vm191_vm1, %v2224_v13 }
 0x1a0   :  { %v1795_v27 = vpop.permute.xlu1 %1794 }
 0x1a1   :  { %v1797_v28 = vunpack.i.h.bf16 %v1795_v27  ;;  %v1796_v29 = vunpack.i.l.bf16 %v1795_v27 }
 0x1a3   :  { %531 = vmatpush.msrb.mxu3 %v1796_v29  ;;  %583 = vmatpush.msrb.mxu1 %v1797_v28 }
 0x1ad   :  { %v239_v30 = vpop.f32.mrf.mxu2 }
 0x1ae   :  { %v213_v31 = vpop.f32.mrf.mxu1  ;;  %v401_v32 = vsel %vm191_vm1, %v239_v30, -inf }
 0x1af   :  { %402 = vmax.xlane.f32.xlu0 %v401_v32  ;;  %v398_v33 = vsel %vm191_vm1, %v213_v31, -inf }
 0x1b0   :  { %399 = vmax.xlane.f32.xlu2 %v398_v33 }
 0x1f7   :  { %v317_v34 = vpop.f32.mrf.mxu2 }
 0x1f8   :  { %v410_v35 = vsel %vm191_vm1, %v317_v34, -inf }
 0x1f9   :  { %411 = vmax.xlane.f32.xlu1 %v410_v35 }
 0x211   :  { %v291_v36 = vpop.f32.mrf.mxu1 }
 0x212   :  { %v265_v37 = vpop.f32.mrf.mxu0  ;;  %v407_v38 = vsel %vm191_vm1, %v291_v36, -inf }
 0x213   :  { %408 = vmax.xlane.f32.xlu2 %v407_v38  ;;  %v404_v39 = vsel %vm191_vm1, %v265_v37, -inf }
 0x214   :  { %405 = vmax.xlane.f32.xlu0 %v404_v39 }
 0x219   :  { %v369_v47 = vpop.f32.mrf.mxu1 }
 0x21a   :  { %v416_v50 = vsel %vm191_vm1, %v369_v47, -inf }
 0x21f   :  { %v343_v40 = vpop.f32.mrf.mxu3 }
 0x220   :  { %v395_v41 = vpop.f32.mrf.mxu2  ;;  %v413_v42 = vsel %vm191_vm1, %v343_v40, -inf }
 0x221   :  { %414 = vmax.xlane.f32.xlu2 %v413_v42  ;;  %v419_v43 = vsel %vm191_vm1, %v395_v41, -inf }
 0x222   :  { %420 = vmax.xlane.f32.xlu1 %v419_v43  ;;  %v403_v44 = vpop.xlane.xlu0 %402 }
 0x223   :  { %v400_v45 = vpop.xlane.xlu2 %399  ;;  %v423_v48 = vsub.f32 %v239_v30, %v403_v44 }
 0x224   :  { %v422_v46 = vsub.f32 %v213_v31, %v400_v45 }
 0x225   :  { %v432_v51 = vmul.f32 1.442695, %v423_v48 }
 0x226   :  { %v430_v49 = vmul.f32 1.442695, %v422_v46 }
 0x228   :  { %1818 = vpow2.f32 %v430_v49 }
 0x229   :  { %417 = vmax.xlane.f32.xlu2 %v416_v50  ;;  %1820 = vpow2.f32 %v432_v51 }
 0x22e   :  { %v2272_v52 = vpop.eup %1818 }
 0x22f   :  { %v446_v53 = vsel %vm191_vm1, %v2272_v52, 0.0  ;;  %v2276_v54 = vpop.eup %1820 }
 0x230   :  { %447 = vadd.xlane.f32.xlu0 %v446_v53  ;;  %v449_v55 = vsel %vm191_vm1, %v2276_v54, 0.0 }
 0x238   :  { %450 = vadd.xlane.f32.xlu0 %v449_v55 }
 0x23b   :  { %588 = vrot.lane.b32.xlu1 %v2226_v14, %s2087_s30 }
 0x241   :  { %1799 = vrot.lane.b32.xlu2 %v1798_v56, %s2087_s30 }
 0x26c   :  { %v412_v57 = vpop.xlane.xlu1 %411 }
 0x26d   :  { %v426_v58 = vsub.f32 %v317_v34, %v412_v57 }
 0x26f   :  { %v438_v59 = vmul.f32 1.442695, %v426_v58 }
 0x271   :  { %1822 = vpow2.f32 %v438_v59 }
 0x277   :  { %v1823_v60 = vpop.eup %1822 }
 0x278   :  { %v458_v61 = vsel %vm191_vm1, %v1823_v60, 0.0 }
 0x279   :  { %459 = vadd.xlane.f32.xlu2 %v458_v61 }
 0x286   :  { %v409_v62 = vpop.xlane.xlu2 %408 }
 0x287   :  { %v425_v63 = vsub.f32 %v291_v36, %v409_v62  ;;  %v406_v0 = vpop.xlane.xlu0 %405 }
 0x288   :  { %v424_v1 = vsub.f32 %v265_v37, %v406_v0 }
 0x289   :  { %v436_v2 = vmul.f32 1.442695, %v425_v63 }
 0x28a   :  { %v434_v3 = vmul.f32 1.442695, %v424_v1 }
 0x28b   :  { %1824 = vpow2.f32 %v436_v2 }
 0x28c   :  { %1826 = vpow2.f32 %v434_v3 }
 0x291   :  { %v2286_v7 = vpop.eup %1824 }
 0x292   :  { %v2288_v8 = vpop.eup %1826  ;;  %v455_v9 = vsel %vm191_vm1, %v2286_v7, 0.0 }
 0x293   :  { %456 = vadd.xlane.f32.xlu2 %v455_v9  ;;  %v452_v10 = vsel %vm191_vm1, %v2288_v8, 0.0 }
 0x294   :  { %453 = vadd.xlane.f32.xlu1 %v452_v10  ;;  %v415_v12 = vpop.xlane.xlu2 %414 }
 0x295   :  { %v421_v14 = vpop.xlane.xlu1 %420  ;;  %v427_v17 = vsub.f32 %v343_v40, %v415_v12 }
 0x296   :  { %v429_v15 = vsub.f32 %v395_v41, %v421_v14 }
 0x297   :  { %v440_v19 = vmul.f32 1.442695, %v427_v17 }
 0x298   :  { %v444_v18 = vmul.f32 1.442695, %v429_v15 }
 0x29a   :  { %1828 = vpow2.f32 %v444_v18 }
 0x29b   :  { %1830 = vpow2.f32 %v440_v19 }
 0x29c   :  { %v418_v20 = vpop.xlane.xlu2 %417 }
 0x29d   :  { %v428_v22 = vsub.f32 %v369_v47, %v418_v20 }
 0x29f   :  { %v442_v25 = vmul.f32 1.442695, %v428_v22 }
 0x2a0   :  { %v2294_v21 = vpop.eup %1828 }
 0x2a1   :  { %v467_v23 = vsel %vm191_vm1, %v2294_v21, 0.0  ;;  %v2298_v29 = vpop.eup %1830 }
 0x2a2   :  { %468 = vadd.xlane.f32.xlu0 %v467_v23  ;;  %v461_v30 = vsel %vm191_vm1, %v2298_v29, 0.0 }
 0x2a3   :  { %v448_v24 = vpop.xlane.xlu0 %447 }
 0x2a4   :  { %1832 = vrcp.f32 %v448_v24  ;;  %v1800_v26 = vpop.permute.xlu2 %1799 }
 0x2a5   :  { %v1802_v27 = vunpack.i.h.bf16 %v1800_v26  ;;  %v1801_v28 = vunpack.i.l.bf16 %v1800_v26  ;;  %1834 = vpow2.f32 %v442_v25 }
 0x2a7   :  { %635 = vmatpush.msra.mxu3 %v1801_v28  ;;  %687 = vmatpush.msra.mxu1 %v1802_v27 }
 0x2aa   :  { %v1833_v31 = vpop.eup %1832  ;;  %462 = vadd.xlane.f32.xlu0 %v461_v30 }
 0x2ab   :  { %v478_v32 = vmul.f32 %v1833_v31, %v448_v24  ;;  %640 = vrot.lane.b32.xlu2 %v2231_v16, %s2087_s30  ;;  %v1835_v35 = vpop.eup %1834  ;;  %v451_v46 = vpop.xlane.xlu0 %450 }
 0x2ac   :  { %v464_v38 = vsel %vm191_vm1, %v1835_v35, 0.0 }
 0x2ad   :  { %v486_v33 = vsub.f32 2.0, %v478_v32  ;;  %v589_v34 = vpop.permute.xlu1 %588  ;;  %692 = vrot.lane.b32.xlu1 %v2224_v13, %s2087_s30  ;;  %v173_v32 = vld [vmem:[%s2590_s3 + $0x10] sm:$0xff] }
 0x2ae   :  { %609 = vmatpush.msrb.mxu2 %v589_v34  ;;  %v171_v34 = vld [vmem:[%s2590_s3] sm:$0xff] }
 0x2af   :  { %v494_v36 = vmul.f32 %v1833_v31, %v486_v33  ;;  %v174_v31 = vld [vmem:[%s2590_s3 + $0x18] sm:$0xff]  ;;  %v172_v33 = vld [vmem:[%s2590_s3 + $0x8] sm:$0xff]  ;;  %s1698_s3 = sshll.u32 %s2597_s10, 4  ;;  %s1699_s3 = int_to_ptr.hbm [resolvable:$true] %s1698_s3 }
 0x2b1   :  { %v502_v37 = vmul.f32 %v2272_v52, %v494_v36 }
 0x2b2   :  { %465 = vadd.xlane.f32.xlu0 %v464_v38 }
 0x2b3   :  { %1732 = vmatmul.msk.f32.vlgmr.msrb.gmra.mxu3 %vm191_vm1, %v502_v37 }
 0x2b4   :  { %769 = vmatpush.msrb.mxu3 %v174_v31 }
 0x2b6   :  { %770 = vmatpush.msrb.mxu3 %v173_v32 }
 0x2b8   :  { %771 = vmatpush.msrb.mxu3 %v172_v33 }
 0x2ba   :  { %772 = vmatpush.msrb.mxu3 %v171_v34 }
 0x2c6   :  { %536 = vrot.lane.b32.xlu0 %v2207_v11, %s2087_s30 }
 0x2ec   :  { %v460_v39 = vpop.xlane.xlu2 %459 }
 0x2ed   :  { %1836 = vrcp.f32 %v460_v39 }
 0x2f3   :  { %v1837_v16 = vpop.eup %1836 }
 0x2f4   :  { %v482_v40 = vmul.f32 %v1837_v16, %v460_v39 }
 0x2f6   :  { %v490_v41 = vsub.f32 2.0, %v482_v40 }
 0x2f8   :  { %v498_v42 = vmul.f32 %v1837_v16, %v490_v41 }
 0x2fa   :  { %v506_v13 = vmul.f32 %v1823_v60, %v498_v42 }
 0x2fc   :  { %1736 = vmatmul.msk.f32.vlgmr.msra.gmra.mxu3 %vm191_vm1, %v506_v13 }
 0x306   :  { %v457_v43 = vpop.xlane.xlu2 %456 }
 0x307   :  { %1838 = vrcp.f32 %v457_v43  ;;  %v454_v44 = vpop.xlane.xlu1 %453 }
 0x308   :  { %1840 = vrcp.f32 %v454_v44 }
 0x30d   :  { %v1839_v45 = vpop.eup %1838 }
 0x30e   :  { %v1841_v47 = vpop.eup %1840  ;;  %v481_v48 = vmul.f32 %v1839_v45, %v457_v43 }
 0x30f   :  { %v480_v49 = vmul.f32 %v1841_v47, %v454_v44 }
 0x310   :  { %v489_v50 = vsub.f32 2.0, %v481_v48 }
 0x311   :  { %v488_v11 = vsub.f32 2.0, %v480_v49 }
 0x312   :  { %v497_v51 = vmul.f32 %v1839_v45, %v489_v50  ;;  %v750_v45 = vperm.slane %v2203_v6, 1 }
 0x313   :  { %v496_v52 = vmul.f32 %v1841_v47, %v488_v11 }
 0x314   :  { %v505_v53 = vmul.f32 %v2286_v7, %v497_v51 }
 0x315   :  { %v504_v55 = vmul.f32 %v2288_v8, %v496_v52  ;;  %v469_v56 = vpop.xlane.xlu0 %468 }
 0x316   :  { %1842 = vrcp.f32 %v469_v56  ;;  %1735 = vmatmul.msk.f32.vlgmr.msrb.gmra.mxu2 %vm191_vm1, %v505_v53  ;;  %v2090_v53 = vmov 32.0  }
 0x317   :  { %1734 = vmatmul.msk.f32.vlgmr.msrb.gmra.mxu1 %vm191_vm1, %v504_v55  ;;  %1844 = vrcp.f32 %v451_v46 }
 0x31c   :  { %v1843_v57 = vpop.eup %1842 }
 0x31d   :  { %v485_v58 = vmul.f32 %v1843_v57, %v469_v56  ;;  %v463_v59 = vpop.xlane.xlu0 %462  ;;  %v1845_v1 = vpop.eup %1844 }
 0x31e   :  { %v479_v3 = vmul.f32 %v1845_v1, %v451_v46 }
 0x31f   :  { %v493_v60 = vsub.f32 2.0, %v485_v58  ;;  %v693_v61 = vpop.permute.xlu1 %692  ;;  %v875_v58 = vld [vmem:[#allocation7 + $0x10] sm:$0xff] }
 0x320   :  { %713 = vmatpush.msra.mxu2 %v693_v61  ;;  %v487_v9 = vsub.f32 2.0, %v479_v3  ;;  %v132_v61 = vld [vmem:[#allocation5] sm:$0xff] }
 0x321   :  { %v501_v62 = vmul.f32 %v1843_v57, %v493_v60  ;;  %v876_v57 = vld [vmem:[#allocation7 + $0x18] sm:$0xff]  ;;  %v874_v60 = vld [vmem:[#allocation7 + $0x8] sm:$0xff] }
 0x322   :  { %v495_v15 = vmul.f32 %v1845_v1, %v487_v9  ;;  %896 = vmatpush.msrb.mxu1 %v876_v57 }
 0x323   :  { %v509_v63 = vmul.f32 %v2294_v21, %v501_v62  ;;  %v641_v21 = vpop.permute.xlu2 %640 }
 0x324   :  { %v503_v18 = vmul.f32 %v2276_v54, %v495_v15  ;;  %897 = vmatpush.msrb.mxu1 %v875_v58  ;;  %v133_v15 = vld [vmem:[#allocation5 + $0x8] sm:$0xff] }
 0x325   :  { %1739 = vmatmul.msk.f32.vlgmr.msra.gmra.mxu2 %vm191_vm1, %v509_v63  ;;  %v466_v0 = vpop.xlane.xlu0 %465 }
 0x326   :  { %1846 = vrcp.f32 %v466_v0  ;;  %898 = vmatpush.msrb.mxu1 %v874_v60 }
 0x327   :  { %1848 = vrcp.f32 %v463_v59 }
 0x328   :  { %1850 = vrcp.f32 %v2090_v53  ;;  %v843_v53 = vperm.slane %v2203_v6, 2 }
 0x32c   :  { %v1847_v2 = vpop.eup %1846 }
 0x32d   :  { %v484_v7 = vmul.f32 %v1847_v2, %v466_v0  ;;  %v1849_v10 = vpop.eup %1848 }
 0x32e   :  { %v483_v17 = vmul.f32 %v1849_v10, %v463_v59  ;;  %v1851_v55 = vpop.eup %1850 }
 0x32f   :  { %v492_v8 = vsub.f32 2.0, %v484_v7  ;;  %v789_v56 = vmul.f32 32.0, %v1851_v55  ;;  %vm793_vm4 = vweird.f32 %v1851_v55 }
 0x330   :  { %v491_v19 = vsub.f32 2.0, %v483_v17  ;;  %v842_v17 = vld [vmem:[%s2591_s4 + $0x18] sm:$0xff] }
 0x331   :  { %v500_v12 = vmul.f32 %v1847_v2, %v492_v8  ;;  %v790_v59 = vsub.f32 1.0, %v789_v56 }
 0x332   :  { %v499_v22 = vmul.f32 %v1849_v10, %v491_v19  ;;  %v840_v19 = vld [vmem:[%s2591_s4 + $0x8] sm:$0xff] }
 0x333   :  { %v508_v14 = vmul.f32 %v1835_v35, %v500_v12  ;;  %v791_v62 = vmul.f32 %v1851_v55, %v790_v59 }
 0x334   :  { %v507_v23 = vmul.f32 %v2298_v29, %v499_v22 }
 0x335   :  { %1738 = vmatmul.msk.f32.vlgmr.msra.gmra.mxu1 %vm191_vm1, %v508_v14 }
 0x336   :  { %v533_v24 = vpop.f32.mrf.mxu3 }
 0x338   :  { %v537_v20 = vpop.permute.xlu0 %536 }
 0x339   :  { %557 = vmatpush.msra.mxu0 %v537_v20  ;;  %v839_v20 = vld [vmem:[%s2591_s4] sm:$0xff] }
 0x33a   :  { %1733 = vmatmul.msk.f32.vlgmr.msra.gmra.mxu0 %vm191_vm1, %v503_v18  ;;  %v841_v18 = vld [vmem:[%s2591_s4 + $0x10] sm:$0xff] }
 0x33b   :  { %661 = vmatpush.msrb.mxu0 %v641_v21 }
 0x33d   :  { %862 = vmatpush.msra.mxu0 %v842_v17 }
 0x33f   :  { %863 = vmatpush.msra.mxu0 %v841_v18 }
 0x341   :  { %864 = vmatpush.msra.mxu0 %v840_v19 }
 0x342   :  { %1737 = vmatmul.msk.f32.vlgmr.msrb.gmra.mxu0 %vm191_vm1, %v507_v23 }
 0x343   :  { %865 = vmatpush.msra.mxu0 %v839_v20 }
 0x37f   :  { %v637_v25 = vpop.f32.mrf.mxu3 }
 0x380   :  { %728 = vrot.lane.b32.xlu2 %v637_v25, %s2088_s11 }
 0x394   :  { %v585_v26 = vpop.f32.mrf.mxu1 }
 0x395   :  { %720 = vrot.lane.b32.xlu1 %v585_v26, %s2077_s22 }
 0x399   :  { %v611_v54 = vpop.f32.mrf.mxu2 }
 0x39a   :  { %722 = vrot.lane.b32.xlu0 %v611_v54, %s2077_s22 }
 0x3a8   :  { %v715_v30 = vpop.f32.mrf.mxu2 }
 0x3b2   :  { %v689_v27 = vpop.f32.mrf.mxu1 }
 0x3b3   :  { %736 = vrot.lane.b32.xlu1 %v689_v27, %s2089_s0 }
 0x3b7   :  { %v559_v28 = vpop.f32.mrf.mxu0 }
 0x3bb   :  { %738 = vrot.lane.b32.xlu1 %v715_v30, %s2089_s0 }
 0x3bf   :  { %v663_v29 = vpop.f32.mrf.mxu0 }
 0x3c0   :  { %730 = vrot.lane.b32.xlu2 %v663_v29, %s2088_s11 }
 0x3da   :  { %v729_v36 = vpop.permute.xlu2 %728 }
 0x407   :  { %v721_v35 = vpop.permute.xlu1 %720 }
 0x408   :  { %v742_v37 = vsel %vm191_vm1, %v533_v24, %v721_v35  ;;  %v877_v24 = vperm.slane %v2203_v6, 3 }
 0x409   :  { %v745_v38 = vsel %vm744_vm2, %v742_v37, %v729_v36  ;;  %v2385_v37 = vld [vmem:[#allocation11 + $0x8] sm:$0xff] }
 0x40c   :  { %v723_v40 = vpop.permute.xlu0 %722 }
 0x40d   :  { %v743_v42 = vsel %vm191_vm1, %v559_v28, %v723_v40 }
 0x41a   :  { %v731_v41 = vpop.permute.xlu2 %730 }
 0x41b   :  { %v746_v13 = vsel %vm744_vm2, %v743_v42, %v731_v41  ;;  %v836_v41 = vperm.slane %v2385_v37, 0 }
 0x425   :  { %v737_v39 = vpop.permute.xlu1 %736 }
 0x426   :  { %v748_v16 = vsel %vm747_vm3, %v745_v38, %v737_v39  ;;  %v833_v38 = vperm.slane %v2203_v6, 7 }
 0x427   :  { %1740 = vmatmul.msk.f32.vlgmr.msrb.gmra.mxu3 %vm141_vm0, %v748_v16 }
 0x42d   :  { %v739_v43 = vpop.permute.xlu1 %738 }
 0x42e   :  { %v749_v44 = vsel %vm747_vm3, %v746_v13, %v739_v43 }
 0x42f   :  { %1741 = vmatmul.msk.f32.gmra.mxu3 %vm141_vm0, %v749_v44 }
 0x4aa   :  { %v774_v46 = vpop.f32.mrf.mxu3 }
 0x4ab   :  { %v775_v47 = vadd.f32 %v774_v46, %v750_v45 }
 0x4ad   :  { %v780_v48 = vadd.f32 %v775_v47, %v2195_v4  ;;  %v873_v4 = vld [vmem:[#allocation7] sm:$0xff] }
 0x4ae   :  { %899 = vmatpush.msrb.mxu1 %v873_v4 }
 0x4af   :  { %v782_v49 = vsel %vm141_vm0, %v780_v48, 0.0  ;;  %1744 = vmatmul.msk.f32.vlgmr.msrb.gmra.mxu1 %vm141_vm0, %v132_v61 }
 0x4b0   :  { %783 = vadd.xlane.f32.xlu0 %v782_v49 }
 0x4b2   :  { %v777_v50 = vpop.f32.mrf.mxu3 }
 0x4b3   :  { %v778_v11 = vadd.f32 %v777_v50, %v750_v45 }
 0x4b5   :  { %v781_v51 = vadd.f32 %v778_v11, %v2199_v5  ;;  %v792_v5 = vadd.f32 %v1851_v55, %v791_v62 }
 0x4b7   :  { %v785_v52 = vsel %vm141_vm0, %v781_v51, 0.0  ;;  %v2355_v63 = vsel %vm793_vm4, %v1851_v55, %v792_v5  ;;  %1745 = vmatmul.msk.f32.gmra.mxu1 %vm141_vm0, %v133_v15 }
 0x4b8   :  { %786 = vadd.xlane.f32.xlu2 %v785_v52 }
 0x523   :  { %v784_v0 = vpop.xlane.xlu0 %783 }
 0x524   :  { %v795_v1 = vmul.f32 %v2355_v63, %v784_v0 }
 0x526   :  { %v797_v2 = vsub.f32 %v780_v48, %v795_v1 }
 0x528   :  { %v799_v3 = vmul.f32 %v797_v2, %v797_v2 }
 0x52a   :  { %v801_v7 = vsel %vm141_vm0, %v799_v3, 0.0 }
 0x52b   :  { %v787_v8 = vpop.xlane.xlu2 %786  ;;  %802 = vadd.xlane.f32.xlu1 %v801_v7 }
 0x52c   :  { %v796_v9 = vmul.f32 %v2355_v63, %v787_v8  ;;  %v901_v25 = vpop.f32.mrf.mxu1 }
 0x52d   :  { %v2376_v26 = vadd.f32 %v901_v25, %v877_v24 }
 0x52e   :  { %v798_v10 = vsub.f32 %v781_v51, %v796_v9 }
 0x52f   :  { %927 = vrot.lane.b32.xlu2 %v2376_v26, %s2085_s28  ;;  %1746 = vmatpush.xpose.msk.msrb.mxu2 %vm191_vm1, %v2376_v26 }
 0x530   :  { %v800_v12 = vmul.f32 %v798_v10, %v798_v10 }
 0x532   :  { %v804_v14 = vsel %vm141_vm0, %v800_v12, 0.0 }
 0x533   :  { %805 = vadd.xlane.f32.xlu0 %v804_v14 }
 0x534   :  { %v904_v50 = vpop.f32.mrf.mxu1 }
 0x535   :  { %v2399_v51 = vadd.f32 %v904_v50, %v877_v24 }
 0x537   :  { %1748 = vmatpush.xpose.msk.msra.mxu2 %vm191_vm1, %v2399_v51 }
 0x547   :  { %935 = vrot.lane.b32.xlu0 %v2376_v26, %s2084_s27 }
 0x54f   :  { %933 = vrot.lane.b32.xlu0 %v2399_v51, %s2083_s2 }
 0x557   :  { %929 = vrot.lane.b32.xlu0 %v2399_v51, %s2085_s28 }
 0x55f   :  { %937 = vrot.lane.b32.xlu0 %v2399_v51, %s2084_s27 }
 0x589   :  { %v2397_v11 = vpop.permute.xlu2 %927 }
 0x58a   :  { %1750 = vmatpush.xpose.msk.msra.mxu3 %vm191_vm1, %v2397_v11 }
 0x59e   :  { %v803_v21 = vpop.xlane.xlu1 %802 }
 0x59f   :  { %v807_v22 = vmul.f32 %v803_v21, %v2355_v63 }
 0x5a1   :  { %v809_v23 = vadd.f32 1e-05, %v807_v22 }
 0x5a3   :  { %1852 = vrsqrt.f32 %v809_v23  ;;  %vm817_vm6 = vweird.f32 %v809_v23 }
 0x5a6   :  { %v806_v54 = vpop.xlane.xlu0 %805 }
 0x5a7   :  { %v808_v27 = vmul.f32 %v806_v54, %v2355_v63 }
 0x5a9   :  { %v1853_v28 = vpop.eup %1852  ;;  %v810_v30 = vadd.f32 1e-05, %v808_v27 }
 0x5aa   :  { %v812_v29 = vmul.f32 %v1853_v28, %v809_v23  ;;  %vm818_vm5 = vweird.f32 %v1853_v28 }
 0x5ab   :  { %1854 = vrsqrt.f32 %v810_v30  ;;  %vm819_vm7 = vmor %vm817_vm6, %vm818_vm5  ;;  %vm827_vm9 = vweird.f32 %v810_v30 }
 0x5ac   :  { %v813_v31 = vmul.f32 %v1853_v28, %v812_v29 }
 0x5ae   :  { %v814_v32 = vmul.f32 0.5, %v813_v31 }
 0x5b0   :  { %v815_v33 = vsub.f32 1.5, %v814_v32  ;;  %v1803_v32 = vpack.i.bf16 %v2376_v26, %v2397_v11 }
 0x5b1   :  { %v1855_v34 = vpop.eup %1854 }
 0x5b2   :  { %v816_v35 = vmul.f32 %v1853_v28, %v815_v33  ;;  %v822_v36 = vmul.f32 %v1855_v34, %v810_v30  ;;  %vm828_vm8 = vweird.f32 %v1855_v34 }
 0x5b3   :  { %vm829_vm10 = vmor %vm827_vm9, %vm828_vm8 }
 0x5b4   :  { %v820_v39 = vsel %vm819_vm7, %v1853_v28, %v816_v35  ;;  %v823_v16 = vmul.f32 %v1855_v34, %v822_v36 }
 0x5b5   :  { %v831_v40 = vmul.f32 %v820_v39, %v797_v2 }
 0x5b6   :  { %v824_v42 = vmul.f32 0.5, %v823_v16 }
 0x5b7   :  { %v834_v13 = vmul.f32 %v833_v38, %v831_v40 }
 0x5b8   :  { %v825_v43 = vsub.f32 1.5, %v824_v42 }
 0x5b9   :  { %v2389_v44 = vadd.f32 %v836_v41, %v834_v13  ;;  %v936_v52 = vpop.permute.xlu0 %935 }
 0x5ba   :  { %v826_v45 = vmul.f32 %v1855_v34, %v825_v43  ;;  %1758 = vmatpush.xpose.msk.msrb.mxu3 %vm191_vm1, %v936_v52  ;;  %v1808_v21 = vpack.i.bf16 %v936_v52, %v2399_v51 }
 0x5bb   :  { %1742 = vmatmul.msk.f32.vlgmr.msra.gmra.mxu0 %vm141_vm0, %v2389_v44 }
 0x5bc   :  { %v830_v46 = vsel %vm829_vm10, %v1855_v34, %v826_v45 }
 0x5bd   :  { %v832_v47 = vmul.f32 %v830_v46, %v798_v10 }
 0x5bf   :  { %v835_v48 = vmul.f32 %v833_v38, %v832_v47 }
 0x5c1   :  { %v2393_v49 = vadd.f32 %v836_v41, %v835_v48  ;;  %v2423_v6 = vpop.permute.xlu0 %933 }
 0x5c3   :  { %1743 = vmatmul.msk.f32.gmra.mxu0 %vm141_vm0, %v2393_v49 }
 0x5c9   :  { %v2427_v59 = vpop.permute.xlu0 %929 }
 0x5ca   :  { %1752 = vmatpush.xpose.msk.msrb.mxu0 %vm191_vm1, %v2427_v59 }
 0x5d1   :  { %v2431_v60 = vpop.permute.xlu0 %937 }
 0x5d2   :  { %1760 = vmatpush.xpose.msk.msra.mxu0 %vm191_vm1, %v2431_v60 }
 0x638   :  { %v867_v55 = vpop.f32.mrf.mxu0 }
 0x639   :  { %v868_v56 = vadd.f32 %v867_v55, %v843_v53 }
 0x63b   :  { %921 = vrot.lane.b32.xlu2 %v868_v56, %s2084_s27  ;;  %913 = vrot.lane.b32.xlu1 %v868_v56, %s2085_s28 }
 0x63c   :  { %1747 = vmatmul.msk.f32.vlgmr.msrb.gmra.mxu2 %vm191_vm1, %v868_v56 }
 0x63d   :  { %1756 = vmatpush.xpose.msk.msrb.mxu2 %vm191_vm1, %v2423_v6 }
 0x640   :  { %v870_v57 = vpop.f32.mrf.mxu0 }
 0x641   :  { %v871_v58 = vadd.f32 %v870_v57, %v843_v53 }
 0x643   :  { %931 = vrot.lane.b32.xlu2 %v2376_v26, %s2083_s2  ;;  %919 = vrot.lane.b32.xlu1 %v871_v58, %s2083_s2 }
 0x644   :  { %1749 = vmatmul.msk.f32.vlgmr.msra.gmra.mxu2 %vm191_vm1, %v871_v58 }
 0x64b   :  { %915 = vrot.lane.b32.xlu2 %v871_v58, %s2085_s28  ;;  %917 = vrot.lane.b32.xlu1 %v868_v56, %s2083_s2 }
 0x653   :  { %923 = vrot.lane.b32.xlu1 %v871_v58, %s2084_s27 }
 0x695   :  { %v922_v4 = vpop.permute.xlu2 %921 }
 0x69d   :  { %v2435_v61 = vpop.permute.xlu2 %931 }
 0x69e   :  { %v1813_v62 = vpack.i.bf16 %v2427_v59, %v2435_v61  ;;  %1754 = vmatpush.xpose.msk.msra.mxu1 %vm191_vm1, %v2435_v61 }
 0x6a5   :  { %v916_v5 = vpop.permute.xlu2 %915 }
 0x6a6   :  { %1753 = vmatmul.msk.f32.vlgmr.msrb.gmra.mxu0 %vm191_vm1, %v916_v5 }
 0x6ad   :  { %v914_v0 = vpop.permute.xlu1 %913 }
 0x6ae   :  { %1751 = vmatmul.msk.f32.vlgmr.msra.gmra.mxu3 %vm191_vm1, %v914_v0 }
 0x6b5   :  { %v920_v1 = vpop.permute.xlu1 %919 }
 0x6b6   :  { %1757 = vmatmul.msk.f32.vlgmr.msrb.gmra.mxu2 %vm191_vm1, %v920_v1  ;;  %1759 = vmatmul.msk.f32.vlgmr.msrb.gmra.mxu3 %vm191_vm1, %v922_v4 }
 0x6bd   :  { %v918_v2 = vpop.permute.xlu1 %917 }
 0x6be   :  { %1755 = vmatmul.msk.f32.vlgmr.msra.gmra.mxu1 %vm191_vm1, %v918_v2 }
 0x6bf   :  { %v960_v3 = vpop.f32.mrf.mxu2 }
 0x6c0   :  { %v1131_v7 = vsel %vm191_vm1, %v960_v3, -inf }
 0x6c1   :  { %1132 = vmax.xlane.f32.xlu0 %v1131_v7 }
 0x6c5   :  { %v924_v8 = vpop.permute.xlu1 %923 }
 0x6c6   :  { %1761 = vmatmul.msk.f32.vlgmr.msra.gmra.mxu0 %vm191_vm1, %v924_v8 }
 0x6c7   :  { %v984_v9 = vpop.f32.mrf.mxu2 }
 0x6c8   :  { %v1134_v10 = vsel %vm191_vm1, %v984_v9, -inf }
 0x6c9   :  { %1135 = vmax.xlane.f32.xlu1 %v1134_v10 }
 0x723   :  { %v1032_v12 = vpop.f32.mrf.mxu0 }
 0x724   :  { %v1140_v14 = vsel %vm191_vm1, %v1032_v12, -inf }
 0x725   :  { %1141 = vmax.xlane.f32.xlu1 %v1140_v14 }
 0x731   :  { %v1008_v15 = vpop.f32.mrf.mxu3 }
 0x732   :  { %v1137_v17 = vsel %vm191_vm1, %v1008_v15, -inf }
 0x733   :  { %1138 = vmax.xlane.f32.xlu2 %v1137_v17 }
 0x734   :  { %v1133_v33 = vpop.xlane.xlu0 %1132 }
 0x735   :  { %v1155_v34 = vsub.f32 %v960_v3, %v1133_v33 }
 0x737   :  { %v1163_v35 = vmul.f32 1.442695, %v1155_v34 }
 0x739   :  { %v1104_v18 = vpop.f32.mrf.mxu3  ;;  %v1080_v25 = vpop.f32.mrf.mxu2 }
 0x73a   :  { %v1149_v19 = vsel %vm191_vm1, %v1104_v18, -inf  ;;  %v1146_v27 = vsel %vm191_vm1, %v1080_v25, -inf }
 0x73b   :  { %v1056_v20 = vpop.f32.mrf.mxu1  ;;  %1150 = vmax.xlane.f32.xlu2 %v1149_v19 }
 0x73c   :  { %v1136_v22 = vpop.xlane.xlu1 %1135  ;;  %v1143_v23 = vsel %vm191_vm1, %v1056_v20, -inf }
 0x73d   :  { %v1156_v24 = vsub.f32 %v984_v9, %v1136_v22  ;;  %1144 = vmax.xlane.f32.xlu0 %v1143_v23 }
 0x73e   :  { %1809 = vrot.lane.b32.xlu1 %v1808_v21, %s2086_s29 }
 0x73f   :  { %v1165_v54 = vmul.f32 1.442695, %v1156_v24 }
 0x741   :  { %1856 = vpow2.f32 %v1165_v54 }
 0x742   :  { %1858 = vpow2.f32 %v1163_v35 }
 0x743   :  { %1147 = vmax.xlane.f32.xlu2 %v1146_v27  ;;  %v1128_v28 = vpop.f32.mrf.mxu0 }
 0x744   :  { %v1152_v30 = vsel %vm191_vm1, %v1128_v28, -inf }
 0x745   :  { %1153 = vmax.xlane.f32.xlu0 %v1152_v30 }
 0x747   :  { %v2457_v29 = vpop.eup %1856 }
 0x748   :  { %v1182_v31 = vsel %vm191_vm1, %v2457_v29, 0.0  ;;  %v2464_v36 = vpop.eup %1858 }
 0x749   :  { %v1179_v38 = vsel %vm191_vm1, %v2464_v36, 0.0 }
 0x74d   :  { %1183 = vadd.xlane.f32.xlu0 %v1182_v31 }
 0x75b   :  { %1804 = vrot.lane.b32.xlu2 %v1803_v32, %s2086_s29 }
 0x784   :  { %1180 = vadd.xlane.f32.xlu2 %v1179_v38 }
 0x798   :  { %v1142_v39 = vpop.xlane.xlu1 %1141 }
 0x799   :  { %v1158_v16 = vsub.f32 %v1032_v12, %v1142_v39 }
 0x79b   :  { %v1169_v40 = vmul.f32 1.442695, %v1158_v16 }
 0x79d   :  { %1860 = vpow2.f32 %v1169_v40 }
 0x7a3   :  { %v2468_v41 = vpop.eup %1860 }
 0x7a4   :  { %v1188_v26 = vsel %vm191_vm1, %v2468_v41, 0.0 }
 0x7a5   :  { %1189 = vadd.xlane.f32.xlu0 %v1188_v26 }
 0x7a6   :  { %v1139_v42 = vpop.xlane.xlu2 %1138 }
 0x7a7   :  { %v1157_v13 = vsub.f32 %v1008_v15, %v1139_v42 }
 0x7a9   :  { %v1167_v43 = vmul.f32 1.442695, %v1157_v13 }
 0x7ab   :  { %1862 = vpow2.f32 %v1167_v43 }
 0x7ae   :  { %v1151_v45 = vpop.xlane.xlu2 %1150 }
 0x7af   :  { %v1161_v46 = vsub.f32 %v1104_v18, %v1151_v45 }
 0x7b0   :  { %v1810_v47 = vpop.permute.xlu1 %1809  ;;  %v1145_v48 = vpop.xlane.xlu0 %1144 }
 0x7b1   :  { %v2472_v50 = vpop.eup %1862  ;;  %v1175_v11 = vmul.f32 1.442695, %v1161_v46  ;;  %v1811_v51 = vunpack.i.l.bf16 %v1810_v47  ;;  %v1159_v52 = vsub.f32 %v1056_v20, %v1145_v48  ;;  %v1812_v12 = vunpack.i.h.bf16 %v1810_v47 }
 0x7b2   :  { %v1185_v53 = vsel %vm191_vm1, %v2472_v50, 0.0 }
 0x7b3   :  { %1864 = vpow2.f32 %v1175_v11  ;;  %v1171_v55 = vmul.f32 1.442695, %v1159_v52  ;;  %1186 = vadd.xlane.f32.xlu1 %v1185_v53  ;;  %1290 = vmatpush.msra.mxu2 %v1811_v51 }
 0x7b5   :  { %1866 = vpow2.f32 %v1171_v55 }
 0x7b6   :  { %v1148_v56 = vpop.xlane.xlu2 %1147 }
 0x7b7   :  { %v1160_v57 = vsub.f32 %v1080_v25, %v1148_v56 }
 0x7b8   :  { %v1154_v58 = vpop.xlane.xlu0 %1153 }
 0x7b9   :  { %v2476_v4 = vpop.eup %1864  ;;  %v1173_v5 = vmul.f32 1.442695, %v1160_v57  ;;  %v1162_v0 = vsub.f32 %v1128_v28, %v1154_v58 }
 0x7ba   :  { %v1197_v1 = vsel %vm191_vm1, %v2476_v4, 0.0 }
 0x7bb   :  { %v2480_v2 = vpop.eup %1866  ;;  %1868 = vpow2.f32 %v1173_v5  ;;  %v1177_v3 = vmul.f32 1.442695, %v1162_v0  ;;  %1198 = vadd.xlane.f32.xlu1 %v1197_v1 }
 0x7bc   :  { %v1191_v7 = vsel %vm191_vm1, %v2480_v2, 0.0 }
 0x7bd   :  { %1870 = vpow2.f32 %v1177_v3  ;;  %1192 = vadd.xlane.f32.xlu2 %v1191_v7 }
 0x7be   :  { %v1805_v8 = vpop.permute.xlu2 %1804 }
 0x7bf   :  { %v1807_v9 = vunpack.i.h.bf16 %v1805_v8  ;;  %v1806_v10 = vunpack.i.l.bf16 %v1805_v8 }
 0x7c0   :  { %v1184_v14 = vpop.xlane.xlu0 %1183 }
 0x7c1   :  { %v1869_v15 = vpop.eup %1868  ;;  %1872 = vrcp.f32 %v1184_v14  ;;  %1264 = vmatpush.msrb.mxu1 %v1807_v9  ;;  %1316 = vmatpush.msra.mxu3 %v1806_v10 }
 0x7c2   :  { %v1194_v17 = vsel %vm191_vm1, %v1869_v15, 0.0 }
 0x7c3   :  { %1420 = vmatpush.msrb.mxu3 %v1812_v12  ;;  %v2485_v18 = vpop.eup %1870  ;;  %1195 = vadd.xlane.f32.xlu1 %v1194_v17 }
 0x7c4   :  { %v1200_v19 = vsel %vm191_vm1, %v2485_v18, 0.0 }
 0x7c5   :  { %1201 = vadd.xlane.f32.xlu0 %v1200_v19 }
 0x7c7   :  { %v1873_v20 = vpop.eup %1872 }
 0x7c8   :  { %v1212_v21 = vmul.f32 %v1873_v20, %v1184_v14 }
 0x7ca   :  { %v1220_v22 = vsub.f32 2.0, %v1212_v21  ;;  %v909_v21 = vld [vmem:[#allocation8 + $0x10] sm:$0xff] }
 0x7cc   :  { %v1228_v23 = vmul.f32 %v1873_v20, %v1220_v22  ;;  %v908_v22 = vld [vmem:[#allocation8 + $0x8] sm:$0xff] }
 0x7ce   :  { %v1236_v24 = vmul.f32 %v2457_v29, %v1228_v23  ;;  %v907_v23 = vld [vmem:[#allocation8] sm:$0xff] }
 0x7d0   :  { %1763 = vmatmul.msk.f32.vlgmr.msra.gmra.mxu2 %vm191_vm1, %v1236_v24 }
 0x7d5   :  { %1373 = vrot.lane.b32.xlu2 %v2423_v6, %s2086_s29 }
 0x7d9   :  { %1814 = vrot.lane.b32.xlu0 %v1813_v62, %s2086_s29 }
 0x7dc   :  { %1425 = vrot.lane.b32.xlu1 %v2431_v60, %s2086_s29 }
 0x7f7   :  { %v1181_v25 = vpop.xlane.xlu2 %1180 }
 0x7f8   :  { %1874 = vrcp.f32 %v1181_v25 }
 0x7fe   :  { %v1875_v54 = vpop.eup %1874 }
 0x7ff   :  { %v1211_v27 = vmul.f32 %v1875_v54, %v1181_v25 }
 0x801   :  { %v1219_v28 = vsub.f32 2.0, %v1211_v27 }
 0x803   :  { %v1227_v30 = vmul.f32 %v1875_v54, %v1219_v28 }
 0x805   :  { %v1235_v29 = vmul.f32 %v2464_v36, %v1227_v30 }
 0x807   :  { %1762 = vmatmul.msk.f32.vlgmr.msrb.gmra.mxu1 %vm191_vm1, %v1235_v29 }
 0x818   :  { %v1190_v60 = vpop.xlane.xlu0 %1189 }
 0x826   :  { %v1187_v31 = vpop.xlane.xlu1 %1186 }
 0x827   :  { %1876 = vrcp.f32 %v1187_v31 }
 0x82d   :  { %v1877_v6 = vpop.eup %1876 }
 0x82e   :  { %v1213_v32 = vmul.f32 %v1877_v6, %v1187_v31  ;;  %v1199_v33 = vpop.xlane.xlu1 %1198 }
 0x82f   :  { %1878 = vrcp.f32 %v1199_v33 }
 0x830   :  { %v1221_v59 = vsub.f32 2.0, %v1213_v32  ;;  %v1193_v61 = vpop.xlane.xlu2 %1192  ;;  %1880 = vrcp.f32 %v1190_v60 }
 0x832   :  { %v1229_v62 = vmul.f32 %v1877_v6, %v1221_v59 }
 0x834   :  { %v1237_v34 = vmul.f32 %v2472_v50, %v1229_v62 }
 0x835   :  { %v1879_v35 = vpop.eup %1878 }
 0x836   :  { %v1217_v38 = vmul.f32 %v1879_v35, %v1199_v33  ;;  %1764 = vmatmul.msk.f32.vlgmr.msra.gmra.mxu3 %vm191_vm1, %v1237_v34  ;;  %v1196_v36 = vpop.xlane.xlu1 %1195  ;;  %v1881_v26 = vpop.eup %1880 }
 0x837   :  { %1882 = vrcp.f32 %v1196_v36  ;;  %v1214_v48 = vmul.f32 %v1881_v26, %v1190_v60 }
 0x838   :  { %v1225_v39 = vsub.f32 2.0, %v1217_v38  ;;  %1884 = vrcp.f32 %v1193_v61  ;;  %v1374_v16 = vpop.permute.xlu2 %1373  ;;  %v1202_v43 = vpop.xlane.xlu0 %1201 }
 0x839   :  { %1394 = vmatpush.msrb.mxu2 %v1374_v16  ;;  %1886 = vrcp.f32 %v1202_v43  ;;  %v1222_v52 = vsub.f32 2.0, %v1214_v48 }
 0x83a   :  { %v1233_v40 = vmul.f32 %v1879_v35, %v1225_v39 }
 0x83b   :  { %v1230_v56 = vmul.f32 %v1881_v26, %v1222_v52  ;;  %v1563_v52 = vld [vmem:[#allocation10] sm:$0xff] }
 0x83c   :  { %v1241_v42 = vmul.f32 %v2476_v4, %v1233_v40 }
 0x83d   :  { %v1883_v13 = vpop.eup %1882  ;;  %v1238_v1 = vmul.f32 %v2468_v41, %v1230_v56 }
 0x83e   :  { %v1885_v45 = vpop.eup %1884  ;;  %v1216_v46 = vmul.f32 %v1883_v13, %v1196_v36  ;;  %1768 = vmatmul.msk.f32.vlgmr.msrb.gmra.mxu3 %vm191_vm1, %v1241_v42 }
 0x83f   :  { %v1215_v50 = vmul.f32 %v1885_v45, %v1193_v61  ;;  %v1887_v55 = vpop.eup %1886  ;;  %v2526_v61 = vld [vmem:[#allocation11] sm:$0xff] }
 0x840   :  { %v1224_v47 = vsub.f32 2.0, %v1216_v46  ;;  %v1218_v58 = vmul.f32 %v1887_v55, %v1202_v43  ;;  %v1481_v62 = vperm.slane %v2526_v61, 4 }
 0x841   :  { %v1223_v53 = vsub.f32 2.0, %v1215_v50 }
 0x842   :  { %v1232_v11 = vmul.f32 %v1883_v13, %v1224_v47  ;;  %v1226_v7 = vsub.f32 2.0, %v1218_v58 }
 0x843   :  { %v1231_v57 = vmul.f32 %v1885_v45, %v1223_v53 }
 0x844   :  { %v1240_v51 = vmul.f32 %v1869_v15, %v1232_v11  ;;  %v1234_v9 = vmul.f32 %v1887_v55, %v1226_v7  ;;  %v1565_v11 = vld [vmem:[#allocation10 + $0x10] sm:$0xff]  ;;  %v1604_v7 = vld [vmem:[%s2595_s8 + $0x28] sm:$0xff] }
 0x845   :  { %v1239_v3 = vmul.f32 %v2480_v2, %v1231_v57 }
 0x846   :  { %1767 = vmatmul.msk.f32.vlgmr.msrb.gmra.mxu2 %vm191_vm1, %v1240_v51  ;;  %v1242_v10 = vmul.f32 %v2485_v18, %v1234_v9  ;;  %v910_v18 = vld [vmem:[#allocation8 + $0x18] sm:$0xff]  ;;  %v1564_v51 = vld [vmem:[#allocation10 + $0x8] sm:$0xff] }
 0x84b   :  { %v1815_v4 = vpop.permute.xlu0 %1814 }
 0x84c   :  { %v1817_v5 = vunpack.i.h.bf16 %v1815_v4  ;;  %v1816_v0 = vunpack.i.l.bf16 %v1815_v4 }
 0x84e   :  { %v1426_v8 = vpop.permute.xlu1 %1425  ;;  %1342 = vmatpush.msrb.mxu0 %v1817_v5  ;;  %1368 = vmatpush.msra.mxu1 %v1816_v0  ;;  %v1606_v0 = vld [vmem:[%s2595_s8 + $0x38] sm:$0xff] }
 0x84f   :  { %1765 = vmatmul.msk.f32.vlgmr.msrb.gmra.mxu0 %vm191_vm1, %v1238_v1  ;;  %1766 = vmatmul.msk.f32.vlgmr.msra.gmra.mxu1 %vm191_vm1, %v1239_v3  ;;  %v1605_v1 = vld [vmem:[%s2595_s8 + $0x30] sm:$0xff] }
 0x850   :  { %1446 = vmatpush.msra.mxu0 %v1426_v8  ;;  %1500 = vmatpush.msrb.mxu1 %v910_v18 }
 0x851   :  { %1623 = vmatpush.msra.mxu3 %v1606_v0 }
 0x852   :  { %1501 = vmatpush.msrb.mxu1 %v909_v21 }
 0x853   :  { %v1292_v14 = vpop.f32.mrf.mxu2  ;;  %1624 = vmatpush.msra.mxu3 %v1605_v1 }
 0x854   :  { %1502 = vmatpush.msrb.mxu1 %v908_v22 }
 0x855   :  { %1625 = vmatpush.msra.mxu3 %v1604_v7 }
 0x856   :  { %1503 = vmatpush.msrb.mxu1 %v907_v23 }
 0x857   :  { %1769 = vmatmul.msk.f32.vlgmr.msra.gmra.mxu0 %vm191_vm1, %v1242_v10 }
 0x884   :  { %v1266_v2 = vpop.f32.mrf.mxu1 }
 0x8b9   :  { %v1318_v12 = vpop.f32.mrf.mxu3 }
 0x8ba   :  { %1453 = vrot.lane.b32.xlu0 %v1318_v12, %s2077_s22  ;;  %v1603_v12 = vld [vmem:[%s2595_s8 + $0x20] sm:$0xff] }
 0x8bb   :  { %1626 = vmatpush.msra.mxu3 %v1603_v12 }
 0x8c1   :  { %v1422_v41 = vpop.f32.mrf.mxu3 }
 0x8c2   :  { %1469 = vrot.lane.b32.xlu1 %v1422_v41, %s2089_s0  ;;  %v1557_v41 = vperm.slane %v2385_v37, 1 }
 0x8c9   :  { %v1396_v19 = vpop.f32.mrf.mxu2 }
 0x8cc   :  { %v1344_v15 = vpop.f32.mrf.mxu0  ;;  %v1370_v17 = vpop.f32.mrf.mxu1 }
 0x8cd   :  { %1455 = vrot.lane.b32.xlu0 %v1344_v15, %s2077_s22  ;;  %1461 = vrot.lane.b32.xlu2 %v1370_v17, %s2088_s11  ;;  %v1602_v15 = vld [vmem:[%s2595_s8 + $0x18] sm:$0xff] }
 0x8ce   :  { %1627 = vmatpush.msra.mxu3 %v1602_v15 }
 0x8d4   :  { %v1448_v20 = vpop.f32.mrf.mxu0 }
 0x8d5   :  { %1471 = vrot.lane.b32.xlu1 %v1448_v20, %s2089_s0  ;;  %1463 = vrot.lane.b32.xlu2 %v1396_v19, %s2088_s11  ;;  %v1560_v19 = vperm.slane %v2385_v37, 2 }
 0x927   :  { %v1462_v54 = vpop.permute.xlu2 %1461 }
 0x92c   :  { %v1454_v24 = vpop.permute.xlu0 %1453 }
 0x92d   :  { %v1475_v25 = vsel %vm191_vm1, %v1266_v2, %v1454_v24 }
 0x92e   :  { %v1477_v28 = vsel %vm744_vm2, %v1475_v25, %v1462_v54 }
 0x92f   :  { %v1464_v6 = vpop.permute.xlu2 %1463 }
 0x934   :  { %v1470_v27 = vpop.permute.xlu1 %1469 }
 0x935   :  { %v1479_v30 = vsel %vm747_vm3, %v1477_v28, %v1470_v27 }
 0x936   :  { %1770 = vmatmul.msk.f32.vlgmr.msrb.gmra.mxu1 %vm141_vm0, %v1479_v30 }
 0x93f   :  { %v1456_v29 = vpop.permute.xlu0 %1455 }
 0x940   :  { %v1476_v31 = vsel %vm191_vm1, %v1292_v14, %v1456_v29 }
 0x941   :  { %v1478_v33 = vsel %vm744_vm2, %v1476_v31, %v1464_v6  ;;  %v1601_v31 = vld [vmem:[%s2595_s8 + $0x10] sm:$0xff]  ;;  %v1600_v6 = vld [vmem:[%s2595_s8 + $0x8] sm:$0xff]  ;;  %vm1608_vm2 = vcmask 523264  }
 0x942   :  { %1628 = vmatpush.msra.mxu3 %v1601_v31 }
 0x944   :  { %1629 = vmatpush.msra.mxu3 %v1600_v6 }
 0x947   :  { %v1472_v32 = vpop.permute.xlu1 %1471 }
 0x948   :  { %v1480_v59 = vsel %vm747_vm3, %v1478_v33, %v1472_v32  ;;  %v1599_v32 = vld [vmem:[%s2595_s8] sm:$0xff]  ;;  %v1567_v33 = vperm.slane %v2526_v61, 5  ;;  %s2091_s8 = smov [#allocation13]  }
 0x949   :  { %1771 = vmatmul.msk.f32.gmra.mxu1 %vm141_vm0, %v1480_v59  ;;  %1630 = vmatpush.msra.mxu3 %v1599_v32  ;;  %s1696_s16 = sshll.u32 %s2091_s8, 4  ;;  %s1697_s16 = int_to_ptr.vmem [resolvable:$true] %s1696_s16 }
 0x9b3   :  { %v1505_v60 = vpop.f32.mrf.mxu1 }
 0x9b4   :  { %v1506_v34 = vadd.f32 %v1505_v60, %v1481_v62 }
 0x9b6   :  { %v1511_v35 = vadd.f32 %v1506_v34, %v2389_v44 }
 0x9b8   :  { %v1513_v38 = vsel %vm141_vm0, %v1511_v35, 0.0 }
 0x9b9   :  { %1514 = vadd.xlane.f32.xlu0 %v1513_v38 }
 0x9c6   :  { %v1508_v36 = vpop.f32.mrf.mxu1 }
 0x9c7   :  { %v1509_v39 = vadd.f32 %v1508_v36, %v1481_v62  ;;  %v1607_v36 = vperm.slane %v2526_v61, 6 }
 0x9c9   :  { %v1512_v16 = vadd.f32 %v1509_v39, %v2393_v49  ;;  %v1566_v49 = vld [vmem:[#allocation10 + $0x18] sm:$0xff] }
 0x9ca   :  { %1586 = vmatpush.msra.mxu2 %v1566_v49 }
 0x9cb   :  { %v1516_v40 = vsel %vm141_vm0, %v1512_v16, 0.0 }
 0x9cc   :  { %1517 = vadd.xlane.f32.xlu2 %v1516_v40  ;;  %1587 = vmatpush.msra.mxu2 %v1565_v11 }
 0x9ce   :  { %1588 = vmatpush.msra.mxu2 %v1564_v51 }
 0x9d0   :  { %1589 = vmatpush.msra.mxu2 %v1563_v52 }
 0xa2c   :  { %v1515_v26 = vpop.xlane.xlu0 %1514 }
 0xa2d   :  { %v1519_v42 = vmul.f32 %v1515_v26, %v2355_v63 }
 0xa2f   :  { %v1521_v13 = vsub.f32 %v1511_v35, %v1519_v42 }
 0xa31   :  { %v1523_v43 = vmul.f32 %v1521_v13, %v1521_v13 }
 0xa33   :  { %v1525_v45 = vsel %vm141_vm0, %v1523_v43, 0.0 }
 0xa34   :  { %1526 = vadd.xlane.f32.xlu1 %v1525_v45 }
 0xa3f   :  { %v1518_v46 = vpop.xlane.xlu2 %1517 }
 0xa40   :  { %v1520_v44 = vmul.f32 %v1518_v46, %v2355_v63 }
 0xa42   :  { %v1522_v47 = vsub.f32 %v1512_v16, %v1520_v44 }
 0xa44   :  { %v1524_v48 = vmul.f32 %v1522_v47, %v1522_v47 }
 0xa46   :  { %v1528_v50 = vsel %vm141_vm0, %v1524_v48, 0.0 }
 0xa47   :  { %1529 = vadd.xlane.f32.xlu0 %v1528_v50 }
 0xaa7   :  { %v1527_v53 = vpop.xlane.xlu1 %1526 }
 0xaa8   :  { %v1531_v55 = vmul.f32 %v1527_v53, %v2355_v63 }
 0xaaa   :  { %v1533_v56 = vadd.f32 1e-05, %v1531_v55 }
 0xaac   :  { %1888 = vrsqrt.f32 %v1533_v56  ;;  %vm1541_vm12 = vweird.f32 %v1533_v56 }
 0xab2   :  { %v1889_v57 = vpop.eup %1888 }
 0xab3   :  { %v1536_v58 = vmul.f32 %v1889_v57, %v1533_v56  ;;  %vm1542_vm11 = vweird.f32 %v1889_v57 }
 0xab4   :  { %vm1543_vm13 = vmor %vm1541_vm12, %vm1542_vm11 }
 0xab5   :  { %v1537_v4 = vmul.f32 %v1889_v57, %v1536_v58 }
 0xab7   :  { %v1538_v5 = vmul.f32 0.5, %v1537_v4 }
 0xab9   :  { %v1539_v3 = vsub.f32 1.5, %v1538_v5 }
 0xaba   :  { %v1530_v8 = vpop.xlane.xlu0 %1529 }
 0xabb   :  { %v1540_v9 = vmul.f32 %v1889_v57, %v1539_v3  ;;  %v1532_v10 = vmul.f32 %v1530_v8, %v2355_v63  ;;  %v1684_v8 = vperm.slane %v2385_v37, 3 }
 0xabd   :  { %v1544_v2 = vsel %vm1543_vm13, %v1889_v57, %v1540_v9  ;;  %v1534_v14 = vadd.f32 1e-05, %v1532_v10 }
 0xabe   :  { %v1555_v17 = vmul.f32 %v1544_v2, %v1521_v13 }
 0xabf   :  { %1890 = vrsqrt.f32 %v1534_v14  ;;  %vm1551_vm15 = vweird.f32 %v1534_v14 }
 0xac0   :  { %v1558_v20 = vmul.f32 %v1557_v41, %v1555_v17 }
 0xac2   :  { %v1561_v18 = vadd.f32 %v1560_v19, %v1558_v20 }
 0xac4   :  { %1772 = vmatmul.msk.f32.vlgmr.msra.gmra.mxu2 %vm141_vm0, %v1561_v18 }
 0xac5   :  { %v1891_v21 = vpop.eup %1890 }
 0xac6   :  { %v1546_v22 = vmul.f32 %v1891_v21, %v1534_v14  ;;  %vm1552_vm14 = vweird.f32 %v1891_v21 }
 0xac7   :  { %vm1553_vm1 = vmor %vm1551_vm15, %vm1552_vm14 }
 0xac8   :  { %v1547_v23 = vmul.f32 %v1891_v21, %v1546_v22 }
 0xaca   :  { %v1548_v24 = vmul.f32 0.5, %v1547_v23 }
 0xacc   :  { %v1549_v25 = vsub.f32 1.5, %v1548_v24 }
 0xace   :  { %v1550_v54 = vmul.f32 %v1891_v21, %v1549_v25 }
 0xad0   :  { %v1554_v27 = vsel %vm1553_vm1, %v1891_v21, %v1550_v54 }
 0xad1   :  { %v1556_v28 = vmul.f32 %v1554_v27, %v1522_v47 }
 0xad3   :  { %v1559_v30 = vmul.f32 %v1557_v41, %v1556_v28  ;;  %v1687_v41 = vperm.slane %v2385_v37, 4 }
 0xad5   :  { %v1562_v29 = vadd.f32 %v1560_v19, %v1559_v30 }
 0xad7   :  { %1773 = vmatmul.msk.f32.gmra.mxu2 %vm141_vm0, %v1562_v29 }
 0xb47   :  { %v1591_v59 = vpop.f32.mrf.mxu2 }
 0xb48   :  { %v1592_v62 = vadd.f32 %v1591_v59, %v1567_v33 }
 0xb4a   :  { %v1597_v60 = vmax.f32 %v1592_v62, 0.0 }
 0xb4c   :  { %1774 = vmatmul.msk.f32.vlgmr.msra.gmra.mxu3 %vm1608_vm2, %v1597_v60 }
 0xb5a   :  { %v1594_v34 = vpop.f32.mrf.mxu2 }
 0xb5b   :  { %v1595_v35 = vadd.f32 %v1594_v34, %v1567_v33 }
 0xb5d   :  { %v1598_v38 = vmax.f32 %v1595_v35, 0.0 }
 0xb5f   :  { %1775 = vmatmul.msk.f32.gmra.mxu3 %vm1608_vm2, %v1598_v38 }
 0xbcf   :  { %v1632_v39 = vpop.f32.mrf.mxu3 }
 0xbd0   :  { %v1633_v16 = vadd.f32 %v1632_v39, %v1607_v36 }
 0xbd2   :  { %v1638_v40 = vadd.f32 %v1633_v16, %v1561_v18 }
 0xbd4   :  { %v1640_v26 = vsel %vm141_vm0, %v1638_v40, 0.0 }
 0xbd5   :  { %1641 = vadd.xlane.f32.xlu2 %v1640_v26 }
 0xbe2   :  { %v1635_v42 = vpop.f32.mrf.mxu3 }
 0xbe3   :  { %v1636_v13 = vadd.f32 %v1635_v42, %v1607_v36 }
 0xbe5   :  { %v1639_v43 = vadd.f32 %v1636_v13, %v1562_v29 }
 0xbe7   :  { %v1643_v45 = vsel %vm141_vm0, %v1639_v43, 0.0 }
 0xbe8   :  { %1644 = vadd.xlane.f32.xlu1 %v1643_v45 }
 0xc48   :  { %v1642_v46 = vpop.xlane.xlu2 %1641 }
 0xc49   :  { %v1646_v44 = vmul.f32 %v1642_v46, %v2355_v63 }
 0xc4b   :  { %v1648_v47 = vsub.f32 %v1638_v40, %v1646_v44 }
 0xc4d   :  { %v1650_v48 = vmul.f32 %v1648_v47, %v1648_v47 }
 0xc4f   :  { %v1652_v50 = vsel %vm141_vm0, %v1650_v48, 0.0 }
 0xc50   :  { %1653 = vadd.xlane.f32.xlu0 %v1652_v50 }
 0xc5b   :  { %v1645_v61 = vpop.xlane.xlu1 %1644 }
 0xc5c   :  { %v1647_v49 = vmul.f32 %v1645_v61, %v2355_v63 }
 0xc5e   :  { %v1649_v11 = vsub.f32 %v1639_v43, %v1647_v49 }
 0xc60   :  { %v1651_v51 = vmul.f32 %v1649_v11, %v1649_v11 }
 0xc62   :  { %v1655_v52 = vsel %vm141_vm0, %v1651_v51, 0.0 }
 0xc63   :  { %1656 = vadd.xlane.f32.xlu2 %v1655_v52 }
 0xcc3   :  { %v1654_v53 = vpop.xlane.xlu0 %1653 }
 0xcc4   :  { %v1658_v55 = vmul.f32 %v1654_v53, %v2355_v63 }
 0xcc6   :  { %v1660_v56 = vadd.f32 1e-05, %v1658_v55 }
 0xcc8   :  { %1892 = vrsqrt.f32 %v1660_v56  ;;  %vm1668_vm4 = vweird.f32 %v1660_v56 }
 0xcce   :  { %v1893_v57 = vpop.eup %1892 }
 0xccf   :  { %v1663_v58 = vmul.f32 %v1893_v57, %v1660_v56  ;;  %vm1669_vm3 = vweird.f32 %v1893_v57 }
 0xcd0   :  { %vm1670_vm5 = vmor %vm1668_vm4, %vm1669_vm3 }
 0xcd1   :  { %v1664_v4 = vmul.f32 %v1893_v57, %v1663_v58 }
 0xcd3   :  { %v1665_v5 = vmul.f32 0.5, %v1664_v4 }
 0xcd5   :  { %v1666_v0 = vsub.f32 1.5, %v1665_v5 }
 0xcd6   :  { %v1657_v1 = vpop.xlane.xlu2 %1656 }
 0xcd7   :  { %v1667_v3 = vmul.f32 %v1893_v57, %v1666_v0  ;;  %v1659_v7 = vmul.f32 %v1657_v1, %v2355_v63 }
 0xcd9   :  { %v1671_v9 = vsel %vm1670_vm5, %v1893_v57, %v1667_v3  ;;  %v1661_v10 = vadd.f32 1e-05, %v1659_v7 }
 0xcda   :  { %v1682_v12 = vmul.f32 %v1671_v9, %v1648_v47 }
 0xcdb   :  { %1894 = vrsqrt.f32 %v1661_v10  ;;  %vm1678_vm7 = vweird.f32 %v1661_v10 }
 0xcdc   :  { %v1685_v2 = vmul.f32 %v1684_v8, %v1682_v12 }
 0xcde   :  { %v1688_v14 = vadd.f32 %v1687_v41, %v1685_v2 }
 0xce0   :  { %1690 = vst.msk [vmem:[#allocation13] sm:$0xff] %vm141_vm0, %v1688_v14 }
 0xce1   :  { %v1895_v15 = vpop.eup %1894 }
 0xce2   :  { %v1673_v17 = vmul.f32 %v1895_v15, %v1661_v10  ;;  %vm1679_vm6 = vweird.f32 %v1895_v15 }
 0xce3   :  { %vm1680_vm8 = vmor %vm1678_vm7, %vm1679_vm6 }
 0xce4   :  { %v1674_v19 = vmul.f32 %v1895_v15, %v1673_v17 }
 0xce6   :  { %v1675_v20 = vmul.f32 0.5, %v1674_v19 }
 0xce8   :  { %v1676_v18 = vsub.f32 1.5, %v1675_v20 }
 0xcea   :  { %v1677_v63 = vmul.f32 %v1895_v15, %v1676_v18 }
 0xcec   :  { %v1681_v21 = vsel %vm1680_vm8, %v1895_v15, %v1677_v63 }
 0xced   :  { %v1683_v22 = vmul.f32 %v1681_v21, %v1649_v11 }
 0xcef   :  { %v1686_v37 = vmul.f32 %v1684_v8, %v1683_v22 }
 0xcf1   :  { %v1689_v23 = vadd.f32 %v1687_v41, %v1686_v37 }
 0xcf3   :  { %1691 = vst.msk [vmem:[#allocation13 + $0x8] sm:$0xff] %vm141_vm0, %v1689_v23 }
 0xcf4   :  { %1704 = dma.vmem_to_hbm [thread:$0]  %s1697_s16, 256, %s1699_s3, [#allocation4], %s2076_s21, %s2076_s21, %s2077_s22  }
 0xcf5   :  { %2073 = dma.done.wait [#allocation4], 256  }
 0xcf6   :  { %2074 = vsyncadd [#allocation4], 4294967040 }
 0xcf7   :  { %1709 = vsyncpa [#allocation3], 1 }
 0xcf8   :  { %1710 = vsyncpa [#allocation6], 1 }
 0xcf9   :  { %1711 = vsyncpa [#allocation9], 1 }
 0xcfa   :  { %1712 = vsyncpa [#allocation12], 1 }
 0xcfb   :  { %1713 = vsyncpa [#allocation4], 1 }

</bundles_post_ra>
